<compile_context>
chip_gen: v5e
topology: v5e:2x2
jax: 0.10.0
libtpu: 0.0.40
codegen_flags: <defaults>
</compile_context>

<pallas_src>
import functools

import jax
import jax.numpy as jnp
from jax.experimental import pallas as pl
from jax.experimental.pallas import tpu as pltpu

_LANES = 128
_SUB = 8  # sublane height of one f32 vreg


def _round_up(x, m):
    return ((x + m - 1) // m) * m


def _raymarch_kernel(colors_ref, geo_ref, packed_ref, *, white_back):
    """One grid step processes a [rows_tile, 128] slab of rays.

    colors_ref: [C, S, rows, 128]
    geo_ref:    [2, S, rows, 128]   (index 0 = densities, 1 = depths)
    packed_ref: [S-1 + C + 2, rows, 128]
    """
    f32 = jnp.float32
    C, S, rows, _ = colors_ref.shape
    Sm1 = S - 1

    # Stream one-vreg-high (8, 128) sub-slabs: all accumulators stay in vregs,
    # nothing spills, and every load/store is a dense unmasked tile.
    for r0 in range(0, rows, _SUB):
        rs = slice(r0, r0 + _SUB)

        dens_prev = geo_ref[0, 0, rs, :].astype(f32)
        deps_prev = geo_ref[1, 0, rs, :].astype(f32)
        cols_prev = [colors_ref[c, 0, rs, :].astype(f32) for c in range(C)]

        trans = jnp.ones_like(dens_prev)
        wtot = jnp.zeros_like(dens_prev)
        acc_depth = jnp.zeros_like(dens_prev)
        acc_rgb = [jnp.zeros_like(dens_prev) for _ in range(C)]

        for s in range(Sm1):
            dens_cur = geo_ref[0, s + 1, rs, :].astype(f32)
            deps_cur = geo_ref[1, s + 1, rs, :].astype(f32)
            cols_cur = [colors_ref[c, s + 1, rs, :].astype(f32)
                        for c in range(C)]

            delta = deps_cur - deps_prev
            dep_mid = (deps_prev + deps_cur) * 0.5
            den_mid = jax.nn.softplus((dens_prev + dens_cur) * 0.5 - 1.0)
            alpha = 1.0 - jnp.exp(-den_mid * delta)

            # weights[s] = alpha[s] * prod_{k<s} (1 - alpha[k] + 1e-10)
            w = alpha * trans
            packed_ref[s, rs, :] = w

            wtot = wtot + w
            acc_depth = acc_depth + w * dep_mid
            for c in range(C):
                acc_rgb[c] = acc_rgb[c] + w * ((cols_prev[c] + cols_cur[c]) * 0.5)
            trans = trans * (1.0 - alpha + 1e-10)

            dens_prev, deps_prev, cols_prev = dens_cur, deps_cur, cols_cur

        comp_depth = acc_depth / (wtot + 0.001)
        for c in range(C):
            rgb = acc_rgb[c]
            if white_back:
                rgb = rgb + 1.0 - wtot
            packed_ref[Sm1 + c, rs, :] = rgb * 2.0 - 1.0
        packed_ref[Sm1 + C, rs, :] = comp_depth
        packed_ref[Sm1 + C + 1, rs, :] = wtot


def mip_ray_marcher(colors, densities, depths, rendering_options,
                    grad_scaling=None, *, tile_rays=8192):
    """Pallas equivalent of extend_MipRayMarcher.forward.

    colors:    [B, R, S, C]
    densities: [B, R, S, 1]
    depths:    [B, R, S, 1]
    """
    assert rendering_options['clamp_mode'] == 'softplus', \
        'MipRayMarcher only supports `clamp_mode`=`softplus`!'
    # TODO(synk): GradientScaler.apply is identity in the forward pass (it only
    # rescales gradients in backward); grad_scaling is ignored and no
    # custom_vjp is attached to this forward-only kernel.

    B, R, S, C = colors.shape
    N = B * R
    Sm1 = S - 1
    white_back = bool(rendering_options.get('white_back', False))

    # --- tiling: rays -> (rows, 128); ~tile_rays rays per grid step, balanced
    # tile count (even when >1) so both v7x TensorCores get equal work.
    rows_needed = pl.cdiv(N, _LANES)
    target_rows = max(_SUB, (tile_rays // _LANES) // _SUB * _SUB)
    if rows_needed <= target_rows:
        num_tiles = 1
        rows_tile = _round_up(rows_needed, _SUB)
    else:
        num_tiles = pl.cdiv(rows_needed, target_rows)
        if num_tiles % 2:
            num_tiles += 1
        rows_tile = _round_up(pl.cdiv(rows_needed, num_tiles), _SUB)
    rows_pad = num_tiles * rows_tile
    n_pad = rows_pad * _LANES

    # Lane-last layout. Keep input dtype; the kernel upcasts per-slice.
    # TODO(synk): an upstream producer emitting this layout directly would
    # remove these transpose/pad copies entirely.
    colors_t = jnp.transpose(colors.reshape(N, S, C), (2, 1, 0))       # [C,S,N]
    geo_t = jnp.transpose(
        jnp.stack([densities.reshape(N, S), depths.reshape(N, S)], axis=0),
        (0, 2, 1))                                                     # [2,S,N]
    if n_pad != N:
        pad = n_pad - N
        colors_t = jnp.pad(colors_t, ((0, 0), (0, 0), (0, pad)))
        geo_t = jnp.pad(geo_t, ((0, 0), (0, 0), (0, pad)))
    colors_t = colors_t.reshape(C, S, rows_pad, _LANES)
    geo_t = geo_t.reshape(2, S, rows_pad, _LANES)

    n_out_rows = Sm1 + C + 2
    kernel = functools.partial(_raymarch_kernel, white_back=white_back)

    packed = pl.pallas_call(
        kernel,
        out_shape=jax.ShapeDtypeStruct((n_out_rows, rows_pad, _LANES),
                                       jnp.float32),
        grid=(num_tiles,),
        in_specs=[
            pl.BlockSpec((C, S, rows_tile, _LANES), lambda i: (0, 0, i, 0)),
            pl.BlockSpec((2, S, rows_tile, _LANES), lambda i: (0, 0, i, 0)),
        ],
        out_specs=pl.BlockSpec((n_out_rows, rows_tile, _LANES),
                               lambda i: (0, i, 0)),
        compiler_params=pltpu.CompilerParams(
            dimension_semantics=("parallel",)),
    )(colors_t, geo_t)

    packed = packed.reshape(n_out_rows, n_pad)[:, :N]   # drop ray padding

    weights = packed[:Sm1].T.reshape(B, R, Sm1, 1)
    composite_rgb = packed[Sm1:Sm1 + C].T.reshape(B, R, C)
    composite_depth = packed[Sm1 + C].reshape(B, R, 1)
    weight_total = packed[Sm1 + C + 1].reshape(B, R, 1)
    return composite_rgb, composite_depth, weights, weight_total


def _reference_marcher(colors, densities, depths, white_back=False):
    """Direct jnp transcription of the PyTorch forward (for validation)."""
    deltas = depths[:, :, 1:] - depths[:, :, :-1]
    colors_mid = (colors[:, :, :-1] + colors[:, :, 1:]) / 2
    densities_mid = (densities[:, :, :-1] + densities[:, :, 1:]) / 2
    depths_mid = (depths[:, :, :-1] + depths[:, :, 1:]) / 2
    densities_mid = jax.nn.softplus(densities_mid - 1)
    density_delta = densities_mid * deltas
    alpha = 1 - jnp.exp(-density_delta)
    alpha_shifted = jnp.concatenate(
        [jnp.ones_like(alpha[:, :, :1]), 1 - alpha + 1e-10], axis=-2)
    weights = alpha * jnp.cumprod(alpha_shifted, axis=-2)[:, :, :-1]
    composite_rgb = jnp.sum(weights * colors_mid, axis=-2)
    weight_total = weights.sum(2)
    composite_depth = jnp.sum(weights * depths_mid, axis=-2) / (weight_total + 0.001)
    if white_back:
        composite_rgb = composite_rgb + 1 - weight_total
    composite_rgb = composite_rgb * 2 - 1
    return composite_rgb, composite_depth, weights, weight_total


if __name__ == "__main__":
    B, R, S, C = 2, 256, 12, 3
    key = jax.random.PRNGKey(0)
    k_col, k_den, k_dep = jax.random.split(key, 3)

    colors = jax.random.uniform(k_col, (B, R, S, C), dtype=jnp.float32)
    densities = jax.random.normal(k_den, (B, R, S, 1), dtype=jnp.float32)
    # monotonically increasing depths along the sample axis
    depth_steps = jax.random.uniform(k_dep, (B, R, S, 1), dtype=jnp.float32) + 0.05
    depths = jnp.cumsum(depth_steps, axis=2) + 1.0

    rendering_options = {'clamp_mode': 'softplus', 'white_back': False}

    out = mip_ray_marcher(colors, densities, depths, rendering_options)
    out = jax.block_until_ready(out)
    rgb, depth, weights, wtot = out

    ref = _reference_marcher(colors, densities, depths, white_back=False)
    ref_rgb, ref_depth, ref_weights, ref_wtot = jax.block_until_ready(ref)

    assert rgb.shape == (B, R, C) and depth.shape == (B, R, 1)
    assert weights.shape == (B, R, S - 1, 1) and wtot.shape == (B, R, 1)
    for a, b in zip((rgb, depth, weights, wtot),
                    (ref_rgb, ref_depth, ref_weights, ref_wtot)):
        assert jnp.allclose(a, b, atol=1e-5, rtol=1e-4), "mismatch vs reference"

    print("KERNEL_OK")
</pallas_src>

<mosaic_0001>
module attributes {stable_mosaic.version = 11 : i64} {
  func.func @_raymarch_kernel(%arg0: i32, %arg1: memref<3x12x8x128xf32, #tpu.memory_space<vmem>>, %arg2: memref<2x12x8x128xf32, #tpu.memory_space<vmem>>, %arg3: memref<16x8x128xf32, #tpu.memory_space<vmem>>) attributes {dimension_semantics = [#tpu.dimension_semantics<parallel>], iteration_bounds = array<i64: 1>, scalar_prefetch = 0 : i64, scratch_operands = 0 : i64, tpu.core_type = #tpu.core_type<tc>, window_params = [{transform_indices = @transform_0, window_bounds = array<i64: 3, 12, 8, 128>}, {transform_indices = @transform_1, window_bounds = array<i64: 2, 12, 8, 128>}, {transform_indices = @transform_2, window_bounds = array<i64: 16, 8, 128>}]} {
    %c0 = arith.constant 0 : index
    %c0_0 = arith.constant 0 : index
    %c0_1 = arith.constant 0 : index
    %c0_2 = arith.constant 0 : index
    %0 = vector.load %arg2[%c0, %c0_0, %c0_1, %c0_2] : memref<2x12x8x128xf32, #tpu.memory_space<vmem>>, vector<1x1x8x128xf32>
    %1 = vector.shape_cast %0 : vector<1x1x8x128xf32> to vector<8x128xf32>
    %c1 = arith.constant 1 : index
    %c0_3 = arith.constant 0 : index
    %c0_4 = arith.constant 0 : index
    %c0_5 = arith.constant 0 : index
    %2 = vector.load %arg2[%c1, %c0_3, %c0_4, %c0_5] : memref<2x12x8x128xf32, #tpu.memory_space<vmem>>, vector<1x1x8x128xf32>
    %3 = vector.shape_cast %2 : vector<1x1x8x128xf32> to vector<8x128xf32>
    %c0_6 = arith.constant 0 : index
    %c0_7 = arith.constant 0 : index
    %c0_8 = arith.constant 0 : index
    %c0_9 = arith.constant 0 : index
    %4 = vector.load %arg1[%c0_6, %c0_7, %c0_8, %c0_9] : memref<3x12x8x128xf32, #tpu.memory_space<vmem>>, vector<1x1x8x128xf32>
    %5 = vector.shape_cast %4 : vector<1x1x8x128xf32> to vector<8x128xf32>
    %c1_10 = arith.constant 1 : index
    %c0_11 = arith.constant 0 : index
    %c0_12 = arith.constant 0 : index
    %c0_13 = arith.constant 0 : index
    %6 = vector.load %arg1[%c1_10, %c0_11, %c0_12, %c0_13] : memref<3x12x8x128xf32, #tpu.memory_space<vmem>>, vector<1x1x8x128xf32>
    %7 = vector.shape_cast %6 : vector<1x1x8x128xf32> to vector<8x128xf32>
    %c2 = arith.constant 2 : index
    %c0_14 = arith.constant 0 : index
    %c0_15 = arith.constant 0 : index
    %c0_16 = arith.constant 0 : index
    %8 = vector.load %arg1[%c2, %c0_14, %c0_15, %c0_16] : memref<3x12x8x128xf32, #tpu.memory_space<vmem>>, vector<1x1x8x128xf32>
    %9 = vector.shape_cast %8 : vector<1x1x8x128xf32> to vector<8x128xf32>
    %cst = arith.constant 1.000000e+00 : f32
    %10 = vector.broadcast %cst : f32 to vector<8x128xf32>
    %cst_17 = arith.constant 0.000000e+00 : f32
    %11 = vector.broadcast %cst_17 : f32 to vector<8x128xf32>
    %cst_18 = arith.constant 0.000000e+00 : f32
    %12 = vector.broadcast %cst_18 : f32 to vector<8x128xf32>
    %cst_19 = arith.constant 0.000000e+00 : f32
    %13 = vector.broadcast %cst_19 : f32 to vector<8x128xf32>
    %cst_20 = arith.constant 0.000000e+00 : f32
    %14 = vector.broadcast %cst_20 : f32 to vector<8x128xf32>
    %cst_21 = arith.constant 0.000000e+00 : f32
    %15 = vector.broadcast %cst_21 : f32 to vector<8x128xf32>
    %c0_22 = arith.constant 0 : index
    %c1_23 = arith.constant 1 : index
    %c0_24 = arith.constant 0 : index
    %c0_25 = arith.constant 0 : index
    %16 = vector.load %arg2[%c0_22, %c1_23, %c0_24, %c0_25] : memref<2x12x8x128xf32, #tpu.memory_space<vmem>>, vector<1x1x8x128xf32>
    %17 = vector.shape_cast %16 : vector<1x1x8x128xf32> to vector<8x128xf32>
    %c1_26 = arith.constant 1 : index
    %c1_27 = arith.constant 1 : index
    %c0_28 = arith.constant 0 : index
    %c0_29 = arith.constant 0 : index
    %18 = vector.load %arg2[%c1_26, %c1_27, %c0_28, %c0_29] : memref<2x12x8x128xf32, #tpu.memory_space<vmem>>, vector<1x1x8x128xf32>
    %19 = vector.shape_cast %18 : vector<1x1x8x128xf32> to vector<8x128xf32>
    %c0_30 = arith.constant 0 : index
    %c1_31 = arith.constant 1 : index
    %c0_32 = arith.constant 0 : index
    %c0_33 = arith.constant 0 : index
    %20 = vector.load %arg1[%c0_30, %c1_31, %c0_32, %c0_33] : memref<3x12x8x128xf32, #tpu.memory_space<vmem>>, vector<1x1x8x128xf32>
    %21 = vector.shape_cast %20 : vector<1x1x8x128xf32> to vector<8x128xf32>
    %c1_34 = arith.constant 1 : index
    %c1_35 = arith.constant 1 : index
    %c0_36 = arith.constant 0 : index
    %c0_37 = arith.constant 0 : index
    %22 = vector.load %arg1[%c1_34, %c1_35, %c0_36, %c0_37] : memref<3x12x8x128xf32, #tpu.memory_space<vmem>>, vector<1x1x8x128xf32>
    %23 = vector.shape_cast %22 : vector<1x1x8x128xf32> to vector<8x128xf32>
    %c2_38 = arith.constant 2 : index
    %c1_39 = arith.constant 1 : index
    %c0_40 = arith.constant 0 : index
    %c0_41 = arith.constant 0 : index
    %24 = vector.load %arg1[%c2_38, %c1_39, %c0_40, %c0_41] : memref<3x12x8x128xf32, #tpu.memory_space<vmem>>, vector<1x1x8x128xf32>
    %25 = vector.shape_cast %24 : vector<1x1x8x128xf32> to vector<8x128xf32>
    %26 = arith.subf %19, %3 : vector<8x128xf32>
    %27 = arith.addf %3, %19 : vector<8x128xf32>
    %cst_42 = arith.constant 5.000000e-01 : f32
    %28 = vector.broadcast %cst_42 : f32 to vector<8x128xf32>
    %29 = arith.mulf %27, %28 : vector<8x128xf32>
    %30 = arith.addf %1, %17 : vector<8x128xf32>
    %cst_43 = arith.constant 5.000000e-01 : f32
    %31 = vector.broadcast %cst_43 : f32 to vector<8x128xf32>
    %32 = arith.mulf %30, %31 : vector<8x128xf32>
    %cst_44 = arith.constant 1.000000e+00 : f32
    %33 = vector.broadcast %cst_44 : f32 to vector<8x128xf32>
    %34 = arith.subf %32, %33 : vector<8x128xf32>
    %cst_45 = arith.constant 0.000000e+00 : f32
    %35 = vector.broadcast %cst_45 : f32 to vector<8x128xf32>
    %36 = arith.maximumf %34, %35 : vector<8x128xf32>
    %37 = vector.broadcast %cst_45 : f32 to vector<8x128xf32>
    %38 = arith.subf %34, %37 : vector<8x128xf32>
    %39 = arith.cmpf one, %38, %38 : vector<8x128xf32>
    %40 = vector.broadcast %cst_45 : f32 to vector<8x128xf32>
    %41 = arith.addf %34, %40 : vector<8x128xf32>
    %42 = math.absf %38 : vector<8x128xf32>
    %cst_46 = arith.constant 0.000000e+00 : f32
    %43 = vector.broadcast %cst_46 : f32 to vector<8x128xf32>
    %44 = arith.subf %43, %42 : vector<8x128xf32>
    %45 = math.exp %44 : vector<8x128xf32>
    %46 = math.log1p %45 : vector<8x128xf32>
    %47 = arith.addf %36, %46 : vector<8x128xf32>
    %48 = arith.select %39, %41, %47 : vector<8x128xi1>, vector<8x128xf32>
    %cst_47 = arith.constant 0.000000e+00 : f32
    %49 = vector.broadcast %cst_47 : f32 to vector<8x128xf32>
    %50 = arith.subf %49, %48 : vector<8x128xf32>
    %51 = arith.mulf %50, %26 : vector<8x128xf32>
    %52 = math.exp %51 : vector<8x128xf32>
    %cst_48 = arith.constant 1.000000e+00 : f32
    %53 = vector.broadcast %cst_48 : f32 to vector<8x128xf32>
    %54 = arith.subf %53, %52 : vector<8x128xf32>
    %55 = arith.mulf %54, %10 : vector<8x128xf32>
    %c0_49 = arith.constant 0 : index
    %c0_50 = arith.constant 0 : index
    %c0_51 = arith.constant 0 : index
    %56 = vector.load %arg3[%c0_49, %c0_50, %c0_51] : memref<16x8x128xf32, #tpu.memory_space<vmem>>, vector<1x8x128xf32>
    %57 = vector.shape_cast %56 : vector<1x8x128xf32> to vector<8x128xf32>
    %58 = vector.shape_cast %55 : vector<8x128xf32> to vector<1x8x128xf32>
    tpu.vector_store %arg3[%c0_49, %c0_50, %c0_51], %58 {strides = array<i32>} : memref<16x8x128xf32, #tpu.memory_space<vmem>>, vector<1x8x128xf32>,
    %59 = arith.addf %11, %55 : vector<8x128xf32>
    %60 = arith.mulf %55, %29 : vector<8x128xf32>
    %61 = arith.addf %12, %60 : vector<8x128xf32>
    %62 = arith.addf %5, %21 : vector<8x128xf32>
    %cst_52 = arith.constant 5.000000e-01 : f32
    %63 = vector.broadcast %cst_52 : f32 to vector<8x128xf32>
    %64 = arith.mulf %62, %63 : vector<8x128xf32>
    %65 = arith.mulf %55, %64 : vector<8x128xf32>
    %66 = arith.addf %13, %65 : vector<8x128xf32>
    %67 = arith.addf %7, %23 : vector<8x128xf32>
    %cst_53 = arith.constant 5.000000e-01 : f32
    %68 = vector.broadcast %cst_53 : f32 to vector<8x128xf32>
    %69 = arith.mulf %67, %68 : vector<8x128xf32>
    %70 = arith.mulf %55, %69 : vector<8x128xf32>
    %71 = arith.addf %14, %70 : vector<8x128xf32>
    %72 = arith.addf %9, %25 : vector<8x128xf32>
    %cst_54 = arith.constant 5.000000e-01 : f32
    %73 = vector.broadcast %cst_54 : f32 to vector<8x128xf32>
    %74 = arith.mulf %72, %73 : vector<8x128xf32>
    %75 = arith.mulf %55, %74 : vector<8x128xf32>
    %76 = arith.addf %15, %75 : vector<8x128xf32>
    %cst_55 = arith.constant 1.000000e+00 : f32
    %77 = vector.broadcast %cst_55 : f32 to vector<8x128xf32>
    %78 = arith.subf %77, %54 : vector<8x128xf32>
    %cst_56 = arith.constant 1.000000e-10 : f32
    %79 = vector.broadcast %cst_56 : f32 to vector<8x128xf32>
    %80 = arith.addf %78, %79 : vector<8x128xf32>
    %81 = arith.mulf %10, %80 : vector<8x128xf32>
    %c0_57 = arith.constant 0 : index
    %c2_58 = arith.constant 2 : index
    %c0_59 = arith.constant 0 : index
    %c0_60 = arith.constant 0 : index
    %82 = vector.load %arg2[%c0_57, %c2_58, %c0_59, %c0_60] : memref<2x12x8x128xf32, #tpu.memory_space<vmem>>, vector<1x1x8x128xf32>
    %83 = vector.shape_cast %82 : vector<1x1x8x128xf32> to vector<8x128xf32>
    %c1_61 = arith.constant 1 : index
    %c2_62 = arith.constant 2 : index
    %c0_63 = arith.constant 0 : index
    %c0_64 = arith.constant 0 : index
    %84 = vector.load %arg2[%c1_61, %c2_62, %c0_63, %c0_64] : memref<2x12x8x128xf32, #tpu.memory_space<vmem>>, vector<1x1x8x128xf32>
    %85 = vector.shape_cast %84 : vector<1x1x8x128xf32> to vector<8x128xf32>
    %c0_65 = arith.constant 0 : index
    %c2_66 = arith.constant 2 : index
    %c0_67 = arith.constant 0 : index
    %c0_68 = arith.constant 0 : index
    %86 = vector.load %arg1[%c0_65, %c2_66, %c0_67, %c0_68] : memref<3x12x8x128xf32, #tpu.memory_space<vmem>>, vector<1x1x8x128xf32>
    %87 = vector.shape_cast %86 : vector<1x1x8x128xf32> to vector<8x128xf32>
    %c1_69 = arith.constant 1 : index
    %c2_70 = arith.constant 2 : index
    %c0_71 = arith.constant 0 : index
    %c0_72 = arith.constant 0 : index
    %88 = vector.load %arg1[%c1_69, %c2_70, %c0_71, %c0_72] : memref<3x12x8x128xf32, #tpu.memory_space<vmem>>, vector<1x1x8x128xf32>
    %89 = vector.shape_cast %88 : vector<1x1x8x128xf32> to vector<8x128xf32>
    %c2_73 = arith.constant 2 : index
    %c2_74 = arith.constant 2 : index
    %c0_75 = arith.constant 0 : index
    %c0_76 = arith.constant 0 : index
    %90 = vector.load %arg1[%c2_73, %c2_74, %c0_75, %c0_76] : memref<3x12x8x128xf32, #tpu.memory_space<vmem>>, vector<1x1x8x128xf32>
    %91 = vector.shape_cast %90 : vector<1x1x8x128xf32> to vector<8x128xf32>
    %92 = arith.subf %85, %19 : vector<8x128xf32>
    %93 = arith.addf %19, %85 : vector<8x128xf32>
    %cst_77 = arith.constant 5.000000e-01 : f32
    %94 = vector.broadcast %cst_77 : f32 to vector<8x128xf32>
    %95 = arith.mulf %93, %94 : vector<8x128xf32>
    %96 = arith.addf %17, %83 : vector<8x128xf32>
    %cst_78 = arith.constant 5.000000e-01 : f32
    %97 = vector.broadcast %cst_78 : f32 to vector<8x128xf32>
    %98 = arith.mulf %96, %97 : vector<8x128xf32>
    %cst_79 = arith.constant 1.000000e+00 : f32
    %99 = vector.broadcast %cst_79 : f32 to vector<8x128xf32>
    %100 = arith.subf %98, %99 : vector<8x128xf32>
    %cst_80 = arith.constant 0.000000e+00 : f32
    %101 = vector.broadcast %cst_80 : f32 to vector<8x128xf32>
    %102 = arith.maximumf %100, %101 : vector<8x128xf32>
    %103 = vector.broadcast %cst_80 : f32 to vector<8x128xf32>
    %104 = arith.subf %100, %103 : vector<8x128xf32>
    %105 = arith.cmpf one, %104, %104 : vector<8x128xf32>
    %106 = vector.broadcast %cst_80 : f32 to vector<8x128xf32>
    %107 = arith.addf %100, %106 : vector<8x128xf32>
    %108 = math.absf %104 : vector<8x128xf32>
    %cst_81 = arith.constant 0.000000e+00 : f32
    %109 = vector.broadcast %cst_81 : f32 to vector<8x128xf32>
    %110 = arith.subf %109, %108 : vector<8x128xf32>
    %111 = math.exp %110 : vector<8x128xf32>
    %112 = math.log1p %111 : vector<8x128xf32>
    %113 = arith.addf %102, %112 : vector<8x128xf32>
    %114 = arith.select %105, %107, %113 : vector<8x128xi1>, vector<8x128xf32>
    %cst_82 = arith.constant 0.000000e+00 : f32
    %115 = vector.broadcast %cst_82 : f32 to vector<8x128xf32>
    %116 = arith.subf %115, %114 : vector<8x128xf32>
    %117 = arith.mulf %116, %92 : vector<8x128xf32>
    %118 = math.exp %117 : vector<8x128xf32>
    %cst_83 = arith.constant 1.000000e+00 : f32
    %119 = vector.broadcast %cst_83 : f32 to vector<8x128xf32>
    %120 = arith.subf %119, %118 : vector<8x128xf32>
    %121 = arith.mulf %120, %81 : vector<8x128xf32>
    %c1_84 = arith.constant 1 : index
    %c0_85 = arith.constant 0 : index
    %c0_86 = arith.constant 0 : index
    %122 = vector.load %arg3[%c1_84, %c0_85, %c0_86] : memref<16x8x128xf32, #tpu.memory_space<vmem>>, vector<1x8x128xf32>
    %123 = vector.shape_cast %122 : vector<1x8x128xf32> to vector<8x128xf32>
    %124 = vector.shape_cast %121 : vector<8x128xf32> to vector<1x8x128xf32>
    tpu.vector_store %arg3[%c1_84, %c0_85, %c0_86], %124 {strides = array<i32>} : memref<16x8x128xf32, #tpu.memory_space<vmem>>, vector<1x8x128xf32>,
    %125 = arith.addf %59, %121 : vector<8x128xf32>
    %126 = arith.mulf %121, %95 : vector<8x128xf32>
    %127 = arith.addf %61, %126 : vector<8x128xf32>
    %128 = arith.addf %21, %87 : vector<8x128xf32>
    %cst_87 = arith.constant 5.000000e-01 : f32
    %129 = vector.broadcast %cst_87 : f32 to vector<8x128xf32>
    %130 = arith.mulf %128, %129 : vector<8x128xf32>
    %131 = arith.mulf %121, %130 : vector<8x128xf32>
    %132 = arith.addf %66, %131 : vector<8x128xf32>
    %133 = arith.addf %23, %89 : vector<8x128xf32>
    %cst_88 = arith.constant 5.000000e-01 : f32
    %134 = vector.broadcast %cst_88 : f32 to vector<8x128xf32>
    %135 = arith.mulf %133, %134 : vector<8x128xf32>
    %136 = arith.mulf %121, %135 : vector<8x128xf32>
    %137 = arith.addf %71, %136 : vector<8x128xf32>
    %138 = arith.addf %25, %91 : vector<8x128xf32>
    %cst_89 = arith.constant 5.000000e-01 : f32
    %139 = vector.broadcast %cst_89 : f32 to vector<8x128xf32>
    %140 = arith.mulf %138, %139 : vector<8x128xf32>
    %141 = arith.mulf %121, %140 : vector<8x128xf32>
    %142 = arith.addf %76, %141 : vector<8x128xf32>
    %cst_90 = arith.constant 1.000000e+00 : f32
    %143 = vector.broadcast %cst_90 : f32 to vector<8x128xf32>
    %144 = arith.subf %143, %120 : vector<8x128xf32>
    %cst_91 = arith.constant 1.000000e-10 : f32
    %145 = vector.broadcast %cst_91 : f32 to vector<8x128xf32>
    %146 = arith.addf %144, %145 : vector<8x128xf32>
    %147 = arith.mulf %81, %146 : vector<8x128xf32>
    %c0_92 = arith.constant 0 : index
    %c3 = arith.constant 3 : index
    %c0_93 = arith.constant 0 : index
    %c0_94 = arith.constant 0 : index
    %148 = vector.load %arg2[%c0_92, %c3, %c0_93, %c0_94] : memref<2x12x8x128xf32, #tpu.memory_space<vmem>>, vector<1x1x8x128xf32>
    %149 = vector.shape_cast %148 : vector<1x1x8x128xf32> to vector<8x128xf32>
    %c1_95 = arith.constant 1 : index
    %c3_96 = arith.constant 3 : index
    %c0_97 = arith.constant 0 : index
    %c0_98 = arith.constant 0 : index
    %150 = vector.load %arg2[%c1_95, %c3_96, %c0_97, %c0_98] : memref<2x12x8x128xf32, #tpu.memory_space<vmem>>, vector<1x1x8x128xf32>
    %151 = vector.shape_cast %150 : vector<1x1x8x128xf32> to vector<8x128xf32>
    %c0_99 = arith.constant 0 : index
    %c3_100 = arith.constant 3 : index
    %c0_101 = arith.constant 0 : index
    %c0_102 = arith.constant 0 : index
    %152 = vector.load %arg1[%c0_99, %c3_100, %c0_101, %c0_102] : memref<3x12x8x128xf32, #tpu.memory_space<vmem>>, vector<1x1x8x128xf32>
    %153 = vector.shape_cast %152 : vector<1x1x8x128xf32> to vector<8x128xf32>
    %c1_103 = arith.constant 1 : index
    %c3_104 = arith.constant 3 : index
    %c0_105 = arith.constant 0 : index
    %c0_106 = arith.constant 0 : index
    %154 = vector.load %arg1[%c1_103, %c3_104, %c0_105, %c0_106] : memref<3x12x8x128xf32, #tpu.memory_space<vmem>>, vector<1x1x8x128xf32>
    %155 = vector.shape_cast %154 : vector<1x1x8x128xf32> to vector<8x128xf32>
    %c2_107 = arith.constant 2 : index
    %c3_108 = arith.constant 3 : index
    %c0_109 = arith.constant 0 : index
    %c0_110 = arith.constant 0 : index
    %156 = vector.load %arg1[%c2_107, %c3_108, %c0_109, %c0_110] : memref<3x12x8x128xf32, #tpu.memory_space<vmem>>, vector<1x1x8x128xf32>
    %157 = vector.shape_cast %156 : vector<1x1x8x128xf32> to vector<8x128xf32>
    %158 = arith.subf %151, %85 : vector<8x128xf32>
    %159 = arith.addf %85, %151 : vector<8x128xf32>
    %cst_111 = arith.constant 5.000000e-01 : f32
    %160 = vector.broadcast %cst_111 : f32 to vector<8x128xf32>
    %161 = arith.mulf %159, %160 : vector<8x128xf32>
    %162 = arith.addf %83, %149 : vector<8x128xf32>
    %cst_112 = arith.constant 5.000000e-01 : f32
    %163 = vector.broadcast %cst_112 : f32 to vector<8x128xf32>
    %164 = arith.mulf %162, %163 : vector<8x128xf32>
    %cst_113 = arith.constant 1.000000e+00 : f32
    %165 = vector.broadcast %cst_113 : f32 to vector<8x128xf32>
    %166 = arith.subf %164, %165 : vector<8x128xf32>
    %cst_114 = arith.constant 0.000000e+00 : f32
    %167 = vector.broadcast %cst_114 : f32 to vector<8x128xf32>
    %168 = arith.maximumf %166, %167 : vector<8x128xf32>
    %169 = vector.broadcast %cst_114 : f32 to vector<8x128xf32>
    %170 = arith.subf %166, %169 : vector<8x128xf32>
    %171 = arith.cmpf one, %170, %170 : vector<8x128xf32>
    %172 = vector.broadcast %cst_114 : f32 to vector<8x128xf32>
    %173 = arith.addf %166, %172 : vector<8x128xf32>
    %174 = math.absf %170 : vector<8x128xf32>
    %cst_115 = arith.constant 0.000000e+00 : f32
    %175 = vector.broadcast %cst_115 : f32 to vector<8x128xf32>
    %176 = arith.subf %175, %174 : vector<8x128xf32>
    %177 = math.exp %176 : vector<8x128xf32>
    %178 = math.log1p %177 : vector<8x128xf32>
    %179 = arith.addf %168, %178 : vector<8x128xf32>
    %180 = arith.select %171, %173, %179 : vector<8x128xi1>, vector<8x128xf32>
    %cst_116 = arith.constant 0.000000e+00 : f32
    %181 = vector.broadcast %cst_116 : f32 to vector<8x128xf32>
    %182 = arith.subf %181, %180 : vector<8x128xf32>
    %183 = arith.mulf %182, %158 : vector<8x128xf32>
    %184 = math.exp %183 : vector<8x128xf32>
    %cst_117 = arith.constant 1.000000e+00 : f32
    %185 = vector.broadcast %cst_117 : f32 to vector<8x128xf32>
    %186 = arith.subf %185, %184 : vector<8x128xf32>
    %187 = arith.mulf %186, %147 : vector<8x128xf32>
    %c2_118 = arith.constant 2 : index
    %c0_119 = arith.constant 0 : index
    %c0_120 = arith.constant 0 : index
    %188 = vector.load %arg3[%c2_118, %c0_119, %c0_120] : memref<16x8x128xf32, #tpu.memory_space<vmem>>, vector<1x8x128xf32>
    %189 = vector.shape_cast %188 : vector<1x8x128xf32> to vector<8x128xf32>
    %190 = vector.shape_cast %187 : vector<8x128xf32> to vector<1x8x128xf32>
    tpu.vector_store %arg3[%c2_118, %c0_119, %c0_120], %190 {strides = array<i32>} : memref<16x8x128xf32, #tpu.memory_space<vmem>>, vector<1x8x128xf32>,
    %191 = arith.addf %125, %187 : vector<8x128xf32>
    %192 = arith.mulf %187, %161 : vector<8x128xf32>
    %193 = arith.addf %127, %192 : vector<8x128xf32>
    %194 = arith.addf %87, %153 : vector<8x128xf32>
    %cst_121 = arith.constant 5.000000e-01 : f32
    %195 = vector.broadcast %cst_121 : f32 to vector<8x128xf32>
    %196 = arith.mulf %194, %195 : vector<8x128xf32>
    %197 = arith.mulf %187, %196 : vector<8x128xf32>
    %198 = arith.addf %132, %197 : vector<8x128xf32>
    %199 = arith.addf %89, %155 : vector<8x128xf32>
    %cst_122 = arith.constant 5.000000e-01 : f32
    %200 = vector.broadcast %cst_122 : f32 to vector<8x128xf32>
    %201 = arith.mulf %199, %200 : vector<8x128xf32>
    %202 = arith.mulf %187, %201 : vector<8x128xf32>
    %203 = arith.addf %137, %202 : vector<8x128xf32>
    %204 = arith.addf %91, %157 : vector<8x128xf32>
    %cst_123 = arith.constant 5.000000e-01 : f32
    %205 = vector.broadcast %cst_123 : f32 to vector<8x128xf32>
    %206 = arith.mulf %204, %205 : vector<8x128xf32>
    %207 = arith.mulf %187, %206 : vector<8x128xf32>
    %208 = arith.addf %142, %207 : vector<8x128xf32>
    %cst_124 = arith.constant 1.000000e+00 : f32
    %209 = vector.broadcast %cst_124 : f32 to vector<8x128xf32>
    %210 = arith.subf %209, %186 : vector<8x128xf32>
    %cst_125 = arith.constant 1.000000e-10 : f32
    %211 = vector.broadcast %cst_125 : f32 to vector<8x128xf32>
    %212 = arith.addf %210, %211 : vector<8x128xf32>
    %213 = arith.mulf %147, %212 : vector<8x128xf32>
    %c0_126 = arith.constant 0 : index
    %c4 = arith.constant 4 : index
    %c0_127 = arith.constant 0 : index
    %c0_128 = arith.constant 0 : index
    %214 = vector.load %arg2[%c0_126, %c4, %c0_127, %c0_128] : memref<2x12x8x128xf32, #tpu.memory_space<vmem>>, vector<1x1x8x128xf32>
    %215 = vector.shape_cast %214 : vector<1x1x8x128xf32> to vector<8x128xf32>
    %c1_129 = arith.constant 1 : index
    %c4_130 = arith.constant 4 : index
    %c0_131 = arith.constant 0 : index
    %c0_132 = arith.constant 0 : index
    %216 = vector.load %arg2[%c1_129, %c4_130, %c0_131, %c0_132] : memref<2x12x8x128xf32, #tpu.memory_space<vmem>>, vector<1x1x8x128xf32>
    %217 = vector.shape_cast %216 : vector<1x1x8x128xf32> to vector<8x128xf32>
    %c0_133 = arith.constant 0 : index
    %c4_134 = arith.constant 4 : index
    %c0_135 = arith.constant 0 : index
    %c0_136 = arith.constant 0 : index
    %218 = vector.load %arg1[%c0_133, %c4_134, %c0_135, %c0_136] : memref<3x12x8x128xf32, #tpu.memory_space<vmem>>, vector<1x1x8x128xf32>
    %219 = vector.shape_cast %218 : vector<1x1x8x128xf32> to vector<8x128xf32>
    %c1_137 = arith.constant 1 : index
    %c4_138 = arith.constant 4 : index
    %c0_139 = arith.constant 0 : index
    %c0_140 = arith.constant 0 : index
    %220 = vector.load %arg1[%c1_137, %c4_138, %c0_139, %c0_140] : memref<3x12x8x128xf32, #tpu.memory_space<vmem>>, vector<1x1x8x128xf32>
    %221 = vector.shape_cast %220 : vector<1x1x8x128xf32> to vector<8x128xf32>
    %c2_141 = arith.constant 2 : index
    %c4_142 = arith.constant 4 : index
    %c0_143 = arith.constant 0 : index
    %c0_144 = arith.constant 0 : index
    %222 = vector.load %arg1[%c2_141, %c4_142, %c0_143, %c0_144] : memref<3x12x8x128xf32, #tpu.memory_space<vmem>>, vector<1x1x8x128xf32>
    %223 = vector.shape_cast %222 : vector<1x1x8x128xf32> to vector<8x128xf32>
    %224 = arith.subf %217, %151 : vector<8x128xf32>
    %225 = arith.addf %151, %217 : vector<8x128xf32>
    %cst_145 = arith.constant 5.000000e-01 : f32
    %226 = vector.broadcast %cst_145 : f32 to vector<8x128xf32>
    %227 = arith.mulf %225, %226 : vector<8x128xf32>
    %228 = arith.addf %149, %215 : vector<8x128xf32>
    %cst_146 = arith.constant 5.000000e-01 : f32
    %229 = vector.broadcast %cst_146 : f32 to vector<8x128xf32>
    %230 = arith.mulf %228, %229 : vector<8x128xf32>
    %cst_147 = arith.constant 1.000000e+00 : f32
    %231 = vector.broadcast %cst_147 : f32 to vector<8x128xf32>
    %232 = arith.subf %230, %231 : vector<8x128xf32>
    %cst_148 = arith.constant 0.000000e+00 : f32
    %233 = vector.broadcast %cst_148 : f32 to vector<8x128xf32>
    %234 = arith.maximumf %232, %233 : vector<8x128xf32>
    %235 = vector.broadcast %cst_148 : f32 to vector<8x128xf32>
    %236 = arith.subf %232, %235 : vector<8x128xf32>
    %237 = arith.cmpf one, %236, %236 : vector<8x128xf32>
    %238 = vector.broadcast %cst_148 : f32 to vector<8x128xf32>
    %239 = arith.addf %232, %238 : vector<8x128xf32>
    %240 = math.absf %236 : vector<8x128xf32>
    %cst_149 = arith.constant 0.000000e+00 : f32
    %241 = vector.broadcast %cst_149 : f32 to vector<8x128xf32>
    %242 = arith.subf %241, %240 : vector<8x128xf32>
    %243 = math.exp %242 : vector<8x128xf32>
    %244 = math.log1p %243 : vector<8x128xf32>
    %245 = arith.addf %234, %244 : vector<8x128xf32>
    %246 = arith.select %237, %239, %245 : vector<8x128xi1>, vector<8x128xf32>
    %cst_150 = arith.constant 0.000000e+00 : f32
    %247 = vector.broadcast %cst_150 : f32 to vector<8x128xf32>
    %248 = arith.subf %247, %246 : vector<8x128xf32>
    %249 = arith.mulf %248, %224 : vector<8x128xf32>
    %250 = math.exp %249 : vector<8x128xf32>
    %cst_151 = arith.constant 1.000000e+00 : f32
    %251 = vector.broadcast %cst_151 : f32 to vector<8x128xf32>
    %252 = arith.subf %251, %250 : vector<8x128xf32>
    %253 = arith.mulf %252, %213 : vector<8x128xf32>
    %c3_152 = arith.constant 3 : index
    %c0_153 = arith.constant 0 : index
    %c0_154 = arith.constant 0 : index
    %254 = vector.load %arg3[%c3_152, %c0_153, %c0_154] : memref<16x8x128xf32, #tpu.memory_space<vmem>>, vector<1x8x128xf32>
    %255 = vector.shape_cast %254 : vector<1x8x128xf32> to vector<8x128xf32>
    %256 = vector.shape_cast %253 : vector<8x128xf32> to vector<1x8x128xf32>
    tpu.vector_store %arg3[%c3_152, %c0_153, %c0_154], %256 {strides = array<i32>} : memref<16x8x128xf32, #tpu.memory_space<vmem>>, vector<1x8x128xf32>,
    %257 = arith.addf %191, %253 : vector<8x128xf32>
    %258 = arith.mulf %253, %227 : vector<8x128xf32>
    %259 = arith.addf %193, %258 : vector<8x128xf32>
    %260 = arith.addf %153, %219 : vector<8x128xf32>
    %cst_155 = arith.constant 5.000000e-01 : f32
    %261 = vector.broadcast %cst_155 : f32 to vector<8x128xf32>
    %262 = arith.mulf %260, %261 : vector<8x128xf32>
    %263 = arith.mulf %253, %262 : vector<8x128xf32>
    %264 = arith.addf %198, %263 : vector<8x128xf32>
    %265 = arith.addf %155, %221 : vector<8x128xf32>
    %cst_156 = arith.constant 5.000000e-01 : f32
    %266 = vector.broadcast %cst_156 : f32 to vector<8x128xf32>
    %267 = arith.mulf %265, %266 : vector<8x128xf32>
    %268 = arith.mulf %253, %267 : vector<8x128xf32>
    %269 = arith.addf %203, %268 : vector<8x128xf32>
    %270 = arith.addf %157, %223 : vector<8x128xf32>
    %cst_157 = arith.constant 5.000000e-01 : f32
    %271 = vector.broadcast %cst_157 : f32 to vector<8x128xf32>
    %272 = arith.mulf %270, %271 : vector<8x128xf32>
    %273 = arith.mulf %253, %272 : vector<8x128xf32>
    %274 = arith.addf %208, %273 : vector<8x128xf32>
    %cst_158 = arith.constant 1.000000e+00 : f32
    %275 = vector.broadcast %cst_158 : f32 to vector<8x128xf32>
    %276 = arith.subf %275, %252 : vector<8x128xf32>
    %cst_159 = arith.constant 1.000000e-10 : f32
    %277 = vector.broadcast %cst_159 : f32 to vector<8x128xf32>
    %278 = arith.addf %276, %277 : vector<8x128xf32>
    %279 = arith.mulf %213, %278 : vector<8x128xf32>
    %c0_160 = arith.constant 0 : index
    %c5 = arith.constant 5 : index
    %c0_161 = arith.constant 0 : index
    %c0_162 = arith.constant 0 : index
    %280 = vector.load %arg2[%c0_160, %c5, %c0_161, %c0_162] : memref<2x12x8x128xf32, #tpu.memory_space<vmem>>, vector<1x1x8x128xf32>
    %281 = vector.shape_cast %280 : vector<1x1x8x128xf32> to vector<8x128xf32>
    %c1_163 = arith.constant 1 : index
    %c5_164 = arith.constant 5 : index
    %c0_165 = arith.constant 0 : index
    %c0_166 = arith.constant 0 : index
    %282 = vector.load %arg2[%c1_163, %c5_164, %c0_165, %c0_166] : memref<2x12x8x128xf32, #tpu.memory_space<vmem>>, vector<1x1x8x128xf32>
    %283 = vector.shape_cast %282 : vector<1x1x8x128xf32> to vector<8x128xf32>
    %c0_167 = arith.constant 0 : index
    %c5_168 = arith.constant 5 : index
    %c0_169 = arith.constant 0 : index
    %c0_170 = arith.constant 0 : index
    %284 = vector.load %arg1[%c0_167, %c5_168, %c0_169, %c0_170] : memref<3x12x8x128xf32, #tpu.memory_space<vmem>>, vector<1x1x8x128xf32>
    %285 = vector.shape_cast %284 : vector<1x1x8x128xf32> to vector<8x128xf32>
    %c1_171 = arith.constant 1 : index
    %c5_172 = arith.constant 5 : index
    %c0_173 = arith.constant 0 : index
    %c0_174 = arith.constant 0 : index
    %286 = vector.load %arg1[%c1_171, %c5_172, %c0_173, %c0_174] : memref<3x12x8x128xf32, #tpu.memory_space<vmem>>, vector<1x1x8x128xf32>
    %287 = vector.shape_cast %286 : vector<1x1x8x128xf32> to vector<8x128xf32>
    %c2_175 = arith.constant 2 : index
    %c5_176 = arith.constant 5 : index
    %c0_177 = arith.constant 0 : index
    %c0_178 = arith.constant 0 : index
    %288 = vector.load %arg1[%c2_175, %c5_176, %c0_177, %c0_178] : memref<3x12x8x128xf32, #tpu.memory_space<vmem>>, vector<1x1x8x128xf32>
    %289 = vector.shape_cast %288 : vector<1x1x8x128xf32> to vector<8x128xf32>
    %290 = arith.subf %283, %217 : vector<8x128xf32>
    %291 = arith.addf %217, %283 : vector<8x128xf32>
    %cst_179 = arith.constant 5.000000e-01 : f32
    %292 = vector.broadcast %cst_179 : f32 to vector<8x128xf32>
    %293 = arith.mulf %291, %292 : vector<8x128xf32>
    %294 = arith.addf %215, %281 : vector<8x128xf32>
    %cst_180 = arith.constant 5.000000e-01 : f32
    %295 = vector.broadcast %cst_180 : f32 to vector<8x128xf32>
    %296 = arith.mulf %294, %295 : vector<8x128xf32>
    %cst_181 = arith.constant 1.000000e+00 : f32
    %297 = vector.broadcast %cst_181 : f32 to vector<8x128xf32>
    %298 = arith.subf %296, %297 : vector<8x128xf32>
    %cst_182 = arith.constant 0.000000e+00 : f32
    %299 = vector.broadcast %cst_182 : f32 to vector<8x128xf32>
    %300 = arith.maximumf %298, %299 : vector<8x128xf32>
    %301 = vector.broadcast %cst_182 : f32 to vector<8x128xf32>
    %302 = arith.subf %298, %301 : vector<8x128xf32>
    %303 = arith.cmpf one, %302, %302 : vector<8x128xf32>
    %304 = vector.broadcast %cst_182 : f32 to vector<8x128xf32>
    %305 = arith.addf %298, %304 : vector<8x128xf32>
    %306 = math.absf %302 : vector<8x128xf32>
    %cst_183 = arith.constant 0.000000e+00 : f32
    %307 = vector.broadcast %cst_183 : f32 to vector<8x128xf32>
    %308 = arith.subf %307, %306 : vector<8x128xf32>
    %309 = math.exp %308 : vector<8x128xf32>
    %310 = math.log1p %309 : vector<8x128xf32>
    %311 = arith.addf %300, %310 : vector<8x128xf32>
    %312 = arith.select %303, %305, %311 : vector<8x128xi1>, vector<8x128xf32>
    %cst_184 = arith.constant 0.000000e+00 : f32
    %313 = vector.broadcast %cst_184 : f32 to vector<8x128xf32>
    %314 = arith.subf %313, %312 : vector<8x128xf32>
    %315 = arith.mulf %314, %290 : vector<8x128xf32>
    %316 = math.exp %315 : vector<8x128xf32>
    %cst_185 = arith.constant 1.000000e+00 : f32
    %317 = vector.broadcast %cst_185 : f32 to vector<8x128xf32>
    %318 = arith.subf %317, %316 : vector<8x128xf32>
    %319 = arith.mulf %318, %279 : vector<8x128xf32>
    %c4_186 = arith.constant 4 : index
    %c0_187 = arith.constant 0 : index
    %c0_188 = arith.constant 0 : index
    %320 = vector.load %arg3[%c4_186, %c0_187, %c0_188] : memref<16x8x128xf32, #tpu.memory_space<vmem>>, vector<1x8x128xf32>
    %321 = vector.shape_cast %320 : vector<1x8x128xf32> to vector<8x128xf32>
    %322 = vector.shape_cast %319 : vector<8x128xf32> to vector<1x8x128xf32>
    tpu.vector_store %arg3[%c4_186, %c0_187, %c0_188], %322 {strides = array<i32>} : memref<16x8x128xf32, #tpu.memory_space<vmem>>, vector<1x8x128xf32>,
    %323 = arith.addf %257, %319 : vector<8x128xf32>
    %324 = arith.mulf %319, %293 : vector<8x128xf32>
    %325 = arith.addf %259, %324 : vector<8x128xf32>
    %326 = arith.addf %219, %285 : vector<8x128xf32>
    %cst_189 = arith.constant 5.000000e-01 : f32
    %327 = vector.broadcast %cst_189 : f32 to vector<8x128xf32>
    %328 = arith.mulf %326, %327 : vector<8x128xf32>
    %329 = arith.mulf %319, %328 : vector<8x128xf32>
    %330 = arith.addf %264, %329 : vector<8x128xf32>
    %331 = arith.addf %221, %287 : vector<8x128xf32>
    %cst_190 = arith.constant 5.000000e-01 : f32
    %332 = vector.broadcast %cst_190 : f32 to vector<8x128xf32>
    %333 = arith.mulf %331, %332 : vector<8x128xf32>
    %334 = arith.mulf %319, %333 : vector<8x128xf32>
    %335 = arith.addf %269, %334 : vector<8x128xf32>
    %336 = arith.addf %223, %289 : vector<8x128xf32>
    %cst_191 = arith.constant 5.000000e-01 : f32
    %337 = vector.broadcast %cst_191 : f32 to vector<8x128xf32>
    %338 = arith.mulf %336, %337 : vector<8x128xf32>
    %339 = arith.mulf %319, %338 : vector<8x128xf32>
    %340 = arith.addf %274, %339 : vector<8x128xf32>
    %cst_192 = arith.constant 1.000000e+00 : f32
    %341 = vector.broadcast %cst_192 : f32 to vector<8x128xf32>
    %342 = arith.subf %341, %318 : vector<8x128xf32>
    %cst_193 = arith.constant 1.000000e-10 : f32
    %343 = vector.broadcast %cst_193 : f32 to vector<8x128xf32>
    %344 = arith.addf %342, %343 : vector<8x128xf32>
    %345 = arith.mulf %279, %344 : vector<8x128xf32>
    %c0_194 = arith.constant 0 : index
    %c6 = arith.constant 6 : index
    %c0_195 = arith.constant 0 : index
    %c0_196 = arith.constant 0 : index
    %346 = vector.load %arg2[%c0_194, %c6, %c0_195, %c0_196] : memref<2x12x8x128xf32, #tpu.memory_space<vmem>>, vector<1x1x8x128xf32>
    %347 = vector.shape_cast %346 : vector<1x1x8x128xf32> to vector<8x128xf32>
    %c1_197 = arith.constant 1 : index
    %c6_198 = arith.constant 6 : index
    %c0_199 = arith.constant 0 : index
    %c0_200 = arith.constant 0 : index
    %348 = vector.load %arg2[%c1_197, %c6_198, %c0_199, %c0_200] : memref<2x12x8x128xf32, #tpu.memory_space<vmem>>, vector<1x1x8x128xf32>
    %349 = vector.shape_cast %348 : vector<1x1x8x128xf32> to vector<8x128xf32>
    %c0_201 = arith.constant 0 : index
    %c6_202 = arith.constant 6 : index
    %c0_203 = arith.constant 0 : index
    %c0_204 = arith.constant 0 : index
    %350 = vector.load %arg1[%c0_201, %c6_202, %c0_203, %c0_204] : memref<3x12x8x128xf32, #tpu.memory_space<vmem>>, vector<1x1x8x128xf32>
    %351 = vector.shape_cast %350 : vector<1x1x8x128xf32> to vector<8x128xf32>
    %c1_205 = arith.constant 1 : index
    %c6_206 = arith.constant 6 : index
    %c0_207 = arith.constant 0 : index
    %c0_208 = arith.constant 0 : index
    %352 = vector.load %arg1[%c1_205, %c6_206, %c0_207, %c0_208] : memref<3x12x8x128xf32, #tpu.memory_space<vmem>>, vector<1x1x8x128xf32>
    %353 = vector.shape_cast %352 : vector<1x1x8x128xf32> to vector<8x128xf32>
    %c2_209 = arith.constant 2 : index
    %c6_210 = arith.constant 6 : index
    %c0_211 = arith.constant 0 : index
    %c0_212 = arith.constant 0 : index
    %354 = vector.load %arg1[%c2_209, %c6_210, %c0_211, %c0_212] : memref<3x12x8x128xf32, #tpu.memory_space<vmem>>, vector<1x1x8x128xf32>
    %355 = vector.shape_cast %354 : vector<1x1x8x128xf32> to vector<8x128xf32>
    %356 = arith.subf %349, %283 : vector<8x128xf32>
    %357 = arith.addf %283, %349 : vector<8x128xf32>
    %cst_213 = arith.constant 5.000000e-01 : f32
    %358 = vector.broadcast %cst_213 : f32 to vector<8x128xf32>
    %359 = arith.mulf %357, %358 : vector<8x128xf32>
    %360 = arith.addf %281, %347 : vector<8x128xf32>
    %cst_214 = arith.constant 5.000000e-01 : f32
    %361 = vector.broadcast %cst_214 : f32 to vector<8x128xf32>
    %362 = arith.mulf %360, %361 : vector<8x128xf32>
    %cst_215 = arith.constant 1.000000e+00 : f32
    %363 = vector.broadcast %cst_215 : f32 to vector<8x128xf32>
    %364 = arith.subf %362, %363 : vector<8x128xf32>
    %cst_216 = arith.constant 0.000000e+00 : f32
    %365 = vector.broadcast %cst_216 : f32 to vector<8x128xf32>
    %366 = arith.maximumf %364, %365 : vector<8x128xf32>
    %367 = vector.broadcast %cst_216 : f32 to vector<8x128xf32>
    %368 = arith.subf %364, %367 : vector<8x128xf32>
    %369 = arith.cmpf one, %368, %368 : vector<8x128xf32>
    %370 = vector.broadcast %cst_216 : f32 to vector<8x128xf32>
    %371 = arith.addf %364, %370 : vector<8x128xf32>
    %372 = math.absf %368 : vector<8x128xf32>
    %cst_217 = arith.constant 0.000000e+00 : f32
    %373 = vector.broadcast %cst_217 : f32 to vector<8x128xf32>
    %374 = arith.subf %373, %372 : vector<8x128xf32>
    %375 = math.exp %374 : vector<8x128xf32>
    %376 = math.log1p %375 : vector<8x128xf32>
    %377 = arith.addf %366, %376 : vector<8x128xf32>
    %378 = arith.select %369, %371, %377 : vector<8x128xi1>, vector<8x128xf32>
    %cst_218 = arith.constant 0.000000e+00 : f32
    %379 = vector.broadcast %cst_218 : f32 to vector<8x128xf32>
    %380 = arith.subf %379, %378 : vector<8x128xf32>
    %381 = arith.mulf %380, %356 : vector<8x128xf32>
    %382 = math.exp %381 : vector<8x128xf32>
    %cst_219 = arith.constant 1.000000e+00 : f32
    %383 = vector.broadcast %cst_219 : f32 to vector<8x128xf32>
    %384 = arith.subf %383, %382 : vector<8x128xf32>
    %385 = arith.mulf %384, %345 : vector<8x128xf32>
    %c5_220 = arith.constant 5 : index
    %c0_221 = arith.constant 0 : index
    %c0_222 = arith.constant 0 : index
    %386 = vector.load %arg3[%c5_220, %c0_221, %c0_222] : memref<16x8x128xf32, #tpu.memory_space<vmem>>, vector<1x8x128xf32>
    %387 = vector.shape_cast %386 : vector<1x8x128xf32> to vector<8x128xf32>
    %388 = vector.shape_cast %385 : vector<8x128xf32> to vector<1x8x128xf32>
    tpu.vector_store %arg3[%c5_220, %c0_221, %c0_222], %388 {strides = array<i32>} : memref<16x8x128xf32, #tpu.memory_space<vmem>>, vector<1x8x128xf32>,
    %389 = arith.addf %323, %385 : vector<8x128xf32>
    %390 = arith.mulf %385, %359 : vector<8x128xf32>
    %391 = arith.addf %325, %390 : vector<8x128xf32>
    %392 = arith.addf %285, %351 : vector<8x128xf32>
    %cst_223 = arith.constant 5.000000e-01 : f32
    %393 = vector.broadcast %cst_223 : f32 to vector<8x128xf32>
    %394 = arith.mulf %392, %393 : vector<8x128xf32>
    %395 = arith.mulf %385, %394 : vector<8x128xf32>
    %396 = arith.addf %330, %395 : vector<8x128xf32>
    %397 = arith.addf %287, %353 : vector<8x128xf32>
    %cst_224 = arith.constant 5.000000e-01 : f32
    %398 = vector.broadcast %cst_224 : f32 to vector<8x128xf32>
    %399 = arith.mulf %397, %398 : vector<8x128xf32>
    %400 = arith.mulf %385, %399 : vector<8x128xf32>
    %401 = arith.addf %335, %400 : vector<8x128xf32>
    %402 = arith.addf %289, %355 : vector<8x128xf32>
    %cst_225 = arith.constant 5.000000e-01 : f32
    %403 = vector.broadcast %cst_225 : f32 to vector<8x128xf32>
    %404 = arith.mulf %402, %403 : vector<8x128xf32>
    %405 = arith.mulf %385, %404 : vector<8x128xf32>
    %406 = arith.addf %340, %405 : vector<8x128xf32>
    %cst_226 = arith.constant 1.000000e+00 : f32
    %407 = vector.broadcast %cst_226 : f32 to vector<8x128xf32>
    %408 = arith.subf %407, %384 : vector<8x128xf32>
    %cst_227 = arith.constant 1.000000e-10 : f32
    %409 = vector.broadcast %cst_227 : f32 to vector<8x128xf32>
    %410 = arith.addf %408, %409 : vector<8x128xf32>
    %411 = arith.mulf %345, %410 : vector<8x128xf32>
    %c0_228 = arith.constant 0 : index
    %c7 = arith.constant 7 : index
    %c0_229 = arith.constant 0 : index
    %c0_230 = arith.constant 0 : index
    %412 = vector.load %arg2[%c0_228, %c7, %c0_229, %c0_230] : memref<2x12x8x128xf32, #tpu.memory_space<vmem>>, vector<1x1x8x128xf32>
    %413 = vector.shape_cast %412 : vector<1x1x8x128xf32> to vector<8x128xf32>
    %c1_231 = arith.constant 1 : index
    %c7_232 = arith.constant 7 : index
    %c0_233 = arith.constant 0 : index
    %c0_234 = arith.constant 0 : index
    %414 = vector.load %arg2[%c1_231, %c7_232, %c0_233, %c0_234] : memref<2x12x8x128xf32, #tpu.memory_space<vmem>>, vector<1x1x8x128xf32>
    %415 = vector.shape_cast %414 : vector<1x1x8x128xf32> to vector<8x128xf32>
    %c0_235 = arith.constant 0 : index
    %c7_236 = arith.constant 7 : index
    %c0_237 = arith.constant 0 : index
    %c0_238 = arith.constant 0 : index
    %416 = vector.load %arg1[%c0_235, %c7_236, %c0_237, %c0_238] : memref<3x12x8x128xf32, #tpu.memory_space<vmem>>, vector<1x1x8x128xf32>
    %417 = vector.shape_cast %416 : vector<1x1x8x128xf32> to vector<8x128xf32>
    %c1_239 = arith.constant 1 : index
    %c7_240 = arith.constant 7 : index
    %c0_241 = arith.constant 0 : index
    %c0_242 = arith.constant 0 : index
    %418 = vector.load %arg1[%c1_239, %c7_240, %c0_241, %c0_242] : memref<3x12x8x128xf32, #tpu.memory_space<vmem>>, vector<1x1x8x128xf32>
    %419 = vector.shape_cast %418 : vector<1x1x8x128xf32> to vector<8x128xf32>
    %c2_243 = arith.constant 2 : index
    %c7_244 = arith.constant 7 : index
    %c0_245 = arith.constant 0 : index
    %c0_246 = arith.constant 0 : index
    %420 = vector.load %arg1[%c2_243, %c7_244, %c0_245, %c0_246] : memref<3x12x8x128xf32, #tpu.memory_space<vmem>>, vector<1x1x8x128xf32>
    %421 = vector.shape_cast %420 : vector<1x1x8x128xf32> to vector<8x128xf32>
    %422 = arith.subf %415, %349 : vector<8x128xf32>
    %423 = arith.addf %349, %415 : vector<8x128xf32>
    %cst_247 = arith.constant 5.000000e-01 : f32
    %424 = vector.broadcast %cst_247 : f32 to vector<8x128xf32>
    %425 = arith.mulf %423, %424 : vector<8x128xf32>
    %426 = arith.addf %347, %413 : vector<8x128xf32>
    %cst_248 = arith.constant 5.000000e-01 : f32
    %427 = vector.broadcast %cst_248 : f32 to vector<8x128xf32>
    %428 = arith.mulf %426, %427 : vector<8x128xf32>
    %cst_249 = arith.constant 1.000000e+00 : f32
    %429 = vector.broadcast %cst_249 : f32 to vector<8x128xf32>
    %430 = arith.subf %428, %429 : vector<8x128xf32>
    %cst_250 = arith.constant 0.000000e+00 : f32
    %431 = vector.broadcast %cst_250 : f32 to vector<8x128xf32>
    %432 = arith.maximumf %430, %431 : vector<8x128xf32>
    %433 = vector.broadcast %cst_250 : f32 to vector<8x128xf32>
    %434 = arith.subf %430, %433 : vector<8x128xf32>
    %435 = arith.cmpf one, %434, %434 : vector<8x128xf32>
    %436 = vector.broadcast %cst_250 : f32 to vector<8x128xf32>
    %437 = arith.addf %430, %436 : vector<8x128xf32>
    %438 = math.absf %434 : vector<8x128xf32>
    %cst_251 = arith.constant 0.000000e+00 : f32
    %439 = vector.broadcast %cst_251 : f32 to vector<8x128xf32>
    %440 = arith.subf %439, %438 : vector<8x128xf32>
    %441 = math.exp %440 : vector<8x128xf32>
    %442 = math.log1p %441 : vector<8x128xf32>
    %443 = arith.addf %432, %442 : vector<8x128xf32>
    %444 = arith.select %435, %437, %443 : vector<8x128xi1>, vector<8x128xf32>
    %cst_252 = arith.constant 0.000000e+00 : f32
    %445 = vector.broadcast %cst_252 : f32 to vector<8x128xf32>
    %446 = arith.subf %445, %444 : vector<8x128xf32>
    %447 = arith.mulf %446, %422 : vector<8x128xf32>
    %448 = math.exp %447 : vector<8x128xf32>
    %cst_253 = arith.constant 1.000000e+00 : f32
    %449 = vector.broadcast %cst_253 : f32 to vector<8x128xf32>
    %450 = arith.subf %449, %448 : vector<8x128xf32>
    %451 = arith.mulf %450, %411 : vector<8x128xf32>
    %c6_254 = arith.constant 6 : index
    %c0_255 = arith.constant 0 : index
    %c0_256 = arith.constant 0 : index
    %452 = vector.load %arg3[%c6_254, %c0_255, %c0_256] : memref<16x8x128xf32, #tpu.memory_space<vmem>>, vector<1x8x128xf32>
    %453 = vector.shape_cast %452 : vector<1x8x128xf32> to vector<8x128xf32>
    %454 = vector.shape_cast %451 : vector<8x128xf32> to vector<1x8x128xf32>
    tpu.vector_store %arg3[%c6_254, %c0_255, %c0_256], %454 {strides = array<i32>} : memref<16x8x128xf32, #tpu.memory_space<vmem>>, vector<1x8x128xf32>,
    %455 = arith.addf %389, %451 : vector<8x128xf32>
    %456 = arith.mulf %451, %425 : vector<8x128xf32>
    %457 = arith.addf %391, %456 : vector<8x128xf32>
    %458 = arith.addf %351, %417 : vector<8x128xf32>
    %cst_257 = arith.constant 5.000000e-01 : f32
    %459 = vector.broadcast %cst_257 : f32 to vector<8x128xf32>
    %460 = arith.mulf %458, %459 : vector<8x128xf32>
    %461 = arith.mulf %451, %460 : vector<8x128xf32>
    %462 = arith.addf %396, %461 : vector<8x128xf32>
    %463 = arith.addf %353, %419 : vector<8x128xf32>
    %cst_258 = arith.constant 5.000000e-01 : f32
    %464 = vector.broadcast %cst_258 : f32 to vector<8x128xf32>
    %465 = arith.mulf %463, %464 : vector<8x128xf32>
    %466 = arith.mulf %451, %465 : vector<8x128xf32>
    %467 = arith.addf %401, %466 : vector<8x128xf32>
    %468 = arith.addf %355, %421 : vector<8x128xf32>
    %cst_259 = arith.constant 5.000000e-01 : f32
    %469 = vector.broadcast %cst_259 : f32 to vector<8x128xf32>
    %470 = arith.mulf %468, %469 : vector<8x128xf32>
    %471 = arith.mulf %451, %470 : vector<8x128xf32>
    %472 = arith.addf %406, %471 : vector<8x128xf32>
    %cst_260 = arith.constant 1.000000e+00 : f32
    %473 = vector.broadcast %cst_260 : f32 to vector<8x128xf32>
    %474 = arith.subf %473, %450 : vector<8x128xf32>
    %cst_261 = arith.constant 1.000000e-10 : f32
    %475 = vector.broadcast %cst_261 : f32 to vector<8x128xf32>
    %476 = arith.addf %474, %475 : vector<8x128xf32>
    %477 = arith.mulf %411, %476 : vector<8x128xf32>
    %c0_262 = arith.constant 0 : index
    %c8 = arith.constant 8 : index
    %c0_263 = arith.constant 0 : index
    %c0_264 = arith.constant 0 : index
    %478 = vector.load %arg2[%c0_262, %c8, %c0_263, %c0_264] : memref<2x12x8x128xf32, #tpu.memory_space<vmem>>, vector<1x1x8x128xf32>
    %479 = vector.shape_cast %478 : vector<1x1x8x128xf32> to vector<8x128xf32>
    %c1_265 = arith.constant 1 : index
    %c8_266 = arith.constant 8 : index
    %c0_267 = arith.constant 0 : index
    %c0_268 = arith.constant 0 : index
    %480 = vector.load %arg2[%c1_265, %c8_266, %c0_267, %c0_268] : memref<2x12x8x128xf32, #tpu.memory_space<vmem>>, vector<1x1x8x128xf32>
    %481 = vector.shape_cast %480 : vector<1x1x8x128xf32> to vector<8x128xf32>
    %c0_269 = arith.constant 0 : index
    %c8_270 = arith.constant 8 : index
    %c0_271 = arith.constant 0 : index
    %c0_272 = arith.constant 0 : index
    %482 = vector.load %arg1[%c0_269, %c8_270, %c0_271, %c0_272] : memref<3x12x8x128xf32, #tpu.memory_space<vmem>>, vector<1x1x8x128xf32>
    %483 = vector.shape_cast %482 : vector<1x1x8x128xf32> to vector<8x128xf32>
    %c1_273 = arith.constant 1 : index
    %c8_274 = arith.constant 8 : index
    %c0_275 = arith.constant 0 : index
    %c0_276 = arith.constant 0 : index
    %484 = vector.load %arg1[%c1_273, %c8_274, %c0_275, %c0_276] : memref<3x12x8x128xf32, #tpu.memory_space<vmem>>, vector<1x1x8x128xf32>
    %485 = vector.shape_cast %484 : vector<1x1x8x128xf32> to vector<8x128xf32>
    %c2_277 = arith.constant 2 : index
    %c8_278 = arith.constant 8 : index
    %c0_279 = arith.constant 0 : index
    %c0_280 = arith.constant 0 : index
    %486 = vector.load %arg1[%c2_277, %c8_278, %c0_279, %c0_280] : memref<3x12x8x128xf32, #tpu.memory_space<vmem>>, vector<1x1x8x128xf32>
    %487 = vector.shape_cast %486 : vector<1x1x8x128xf32> to vector<8x128xf32>
    %488 = arith.subf %481, %415 : vector<8x128xf32>
    %489 = arith.addf %415, %481 : vector<8x128xf32>
    %cst_281 = arith.constant 5.000000e-01 : f32
    %490 = vector.broadcast %cst_281 : f32 to vector<8x128xf32>
    %491 = arith.mulf %489, %490 : vector<8x128xf32>
    %492 = arith.addf %413, %479 : vector<8x128xf32>
    %cst_282 = arith.constant 5.000000e-01 : f32
    %493 = vector.broadcast %cst_282 : f32 to vector<8x128xf32>
    %494 = arith.mulf %492, %493 : vector<8x128xf32>
    %cst_283 = arith.constant 1.000000e+00 : f32
    %495 = vector.broadcast %cst_283 : f32 to vector<8x128xf32>
    %496 = arith.subf %494, %495 : vector<8x128xf32>
    %cst_284 = arith.constant 0.000000e+00 : f32
    %497 = vector.broadcast %cst_284 : f32 to vector<8x128xf32>
    %498 = arith.maximumf %496, %497 : vector<8x128xf32>
    %499 = vector.broadcast %cst_284 : f32 to vector<8x128xf32>
    %500 = arith.subf %496, %499 : vector<8x128xf32>
    %501 = arith.cmpf one, %500, %500 : vector<8x128xf32>
    %502 = vector.broadcast %cst_284 : f32 to vector<8x128xf32>
    %503 = arith.addf %496, %502 : vector<8x128xf32>
    %504 = math.absf %500 : vector<8x128xf32>
    %cst_285 = arith.constant 0.000000e+00 : f32
    %505 = vector.broadcast %cst_285 : f32 to vector<8x128xf32>
    %506 = arith.subf %505, %504 : vector<8x128xf32>
    %507 = math.exp %506 : vector<8x128xf32>
    %508 = math.log1p %507 : vector<8x128xf32>
    %509 = arith.addf %498, %508 : vector<8x128xf32>
    %510 = arith.select %501, %503, %509 : vector<8x128xi1>, vector<8x128xf32>
    %cst_286 = arith.constant 0.000000e+00 : f32
    %511 = vector.broadcast %cst_286 : f32 to vector<8x128xf32>
    %512 = arith.subf %511, %510 : vector<8x128xf32>
    %513 = arith.mulf %512, %488 : vector<8x128xf32>
    %514 = math.exp %513 : vector<8x128xf32>
    %cst_287 = arith.constant 1.000000e+00 : f32
    %515 = vector.broadcast %cst_287 : f32 to vector<8x128xf32>
    %516 = arith.subf %515, %514 : vector<8x128xf32>
    %517 = arith.mulf %516, %477 : vector<8x128xf32>
    %c7_288 = arith.constant 7 : index
    %c0_289 = arith.constant 0 : index
    %c0_290 = arith.constant 0 : index
    %518 = vector.load %arg3[%c7_288, %c0_289, %c0_290] : memref<16x8x128xf32, #tpu.memory_space<vmem>>, vector<1x8x128xf32>
    %519 = vector.shape_cast %518 : vector<1x8x128xf32> to vector<8x128xf32>
    %520 = vector.shape_cast %517 : vector<8x128xf32> to vector<1x8x128xf32>
    tpu.vector_store %arg3[%c7_288, %c0_289, %c0_290], %520 {strides = array<i32>} : memref<16x8x128xf32, #tpu.memory_space<vmem>>, vector<1x8x128xf32>,
    %521 = arith.addf %455, %517 : vector<8x128xf32>
    %522 = arith.mulf %517, %491 : vector<8x128xf32>
    %523 = arith.addf %457, %522 : vector<8x128xf32>
    %524 = arith.addf %417, %483 : vector<8x128xf32>
    %cst_291 = arith.constant 5.000000e-01 : f32
    %525 = vector.broadcast %cst_291 : f32 to vector<8x128xf32>
    %526 = arith.mulf %524, %525 : vector<8x128xf32>
    %527 = arith.mulf %517, %526 : vector<8x128xf32>
    %528 = arith.addf %462, %527 : vector<8x128xf32>
    %529 = arith.addf %419, %485 : vector<8x128xf32>
    %cst_292 = arith.constant 5.000000e-01 : f32
    %530 = vector.broadcast %cst_292 : f32 to vector<8x128xf32>
    %531 = arith.mulf %529, %530 : vector<8x128xf32>
    %532 = arith.mulf %517, %531 : vector<8x128xf32>
    %533 = arith.addf %467, %532 : vector<8x128xf32>
    %534 = arith.addf %421, %487 : vector<8x128xf32>
    %cst_293 = arith.constant 5.000000e-01 : f32
    %535 = vector.broadcast %cst_293 : f32 to vector<8x128xf32>
    %536 = arith.mulf %534, %535 : vector<8x128xf32>
    %537 = arith.mulf %517, %536 : vector<8x128xf32>
    %538 = arith.addf %472, %537 : vector<8x128xf32>
    %cst_294 = arith.constant 1.000000e+00 : f32
    %539 = vector.broadcast %cst_294 : f32 to vector<8x128xf32>
    %540 = arith.subf %539, %516 : vector<8x128xf32>
    %cst_295 = arith.constant 1.000000e-10 : f32
    %541 = vector.broadcast %cst_295 : f32 to vector<8x128xf32>
    %542 = arith.addf %540, %541 : vector<8x128xf32>
    %543 = arith.mulf %477, %542 : vector<8x128xf32>
    %c0_296 = arith.constant 0 : index
    %c9 = arith.constant 9 : index
    %c0_297 = arith.constant 0 : index
    %c0_298 = arith.constant 0 : index
    %544 = vector.load %arg2[%c0_296, %c9, %c0_297, %c0_298] : memref<2x12x8x128xf32, #tpu.memory_space<vmem>>, vector<1x1x8x128xf32>
    %545 = vector.shape_cast %544 : vector<1x1x8x128xf32> to vector<8x128xf32>
    %c1_299 = arith.constant 1 : index
    %c9_300 = arith.constant 9 : index
    %c0_301 = arith.constant 0 : index
    %c0_302 = arith.constant 0 : index
    %546 = vector.load %arg2[%c1_299, %c9_300, %c0_301, %c0_302] : memref<2x12x8x128xf32, #tpu.memory_space<vmem>>, vector<1x1x8x128xf32>
    %547 = vector.shape_cast %546 : vector<1x1x8x128xf32> to vector<8x128xf32>
    %c0_303 = arith.constant 0 : index
    %c9_304 = arith.constant 9 : index
    %c0_305 = arith.constant 0 : index
    %c0_306 = arith.constant 0 : index
    %548 = vector.load %arg1[%c0_303, %c9_304, %c0_305, %c0_306] : memref<3x12x8x128xf32, #tpu.memory_space<vmem>>, vector<1x1x8x128xf32>
    %549 = vector.shape_cast %548 : vector<1x1x8x128xf32> to vector<8x128xf32>
    %c1_307 = arith.constant 1 : index
    %c9_308 = arith.constant 9 : index
    %c0_309 = arith.constant 0 : index
    %c0_310 = arith.constant 0 : index
    %550 = vector.load %arg1[%c1_307, %c9_308, %c0_309, %c0_310] : memref<3x12x8x128xf32, #tpu.memory_space<vmem>>, vector<1x1x8x128xf32>
    %551 = vector.shape_cast %550 : vector<1x1x8x128xf32> to vector<8x128xf32>
    %c2_311 = arith.constant 2 : index
    %c9_312 = arith.constant 9 : index
    %c0_313 = arith.constant 0 : index
    %c0_314 = arith.constant 0 : index
    %552 = vector.load %arg1[%c2_311, %c9_312, %c0_313, %c0_314] : memref<3x12x8x128xf32, #tpu.memory_space<vmem>>, vector<1x1x8x128xf32>
    %553 = vector.shape_cast %552 : vector<1x1x8x128xf32> to vector<8x128xf32>
    %554 = arith.subf %547, %481 : vector<8x128xf32>
    %555 = arith.addf %481, %547 : vector<8x128xf32>
    %cst_315 = arith.constant 5.000000e-01 : f32
    %556 = vector.broadcast %cst_315 : f32 to vector<8x128xf32>
    %557 = arith.mulf %555, %556 : vector<8x128xf32>
    %558 = arith.addf %479, %545 : vector<8x128xf32>
    %cst_316 = arith.constant 5.000000e-01 : f32
    %559 = vector.broadcast %cst_316 : f32 to vector<8x128xf32>
    %560 = arith.mulf %558, %559 : vector<8x128xf32>
    %cst_317 = arith.constant 1.000000e+00 : f32
    %561 = vector.broadcast %cst_317 : f32 to vector<8x128xf32>
    %562 = arith.subf %560, %561 : vector<8x128xf32>
    %cst_318 = arith.constant 0.000000e+00 : f32
    %563 = vector.broadcast %cst_318 : f32 to vector<8x128xf32>
    %564 = arith.maximumf %562, %563 : vector<8x128xf32>
    %565 = vector.broadcast %cst_318 : f32 to vector<8x128xf32>
    %566 = arith.subf %562, %565 : vector<8x128xf32>
    %567 = arith.cmpf one, %566, %566 : vector<8x128xf32>
    %568 = vector.broadcast %cst_318 : f32 to vector<8x128xf32>
    %569 = arith.addf %562, %568 : vector<8x128xf32>
    %570 = math.absf %566 : vector<8x128xf32>
    %cst_319 = arith.constant 0.000000e+00 : f32
    %571 = vector.broadcast %cst_319 : f32 to vector<8x128xf32>
    %572 = arith.subf %571, %570 : vector<8x128xf32>
    %573 = math.exp %572 : vector<8x128xf32>
    %574 = math.log1p %573 : vector<8x128xf32>
    %575 = arith.addf %564, %574 : vector<8x128xf32>
    %576 = arith.select %567, %569, %575 : vector<8x128xi1>, vector<8x128xf32>
    %cst_320 = arith.constant 0.000000e+00 : f32
    %577 = vector.broadcast %cst_320 : f32 to vector<8x128xf32>
    %578 = arith.subf %577, %576 : vector<8x128xf32>
    %579 = arith.mulf %578, %554 : vector<8x128xf32>
    %580 = math.exp %579 : vector<8x128xf32>
    %cst_321 = arith.constant 1.000000e+00 : f32
    %581 = vector.broadcast %cst_321 : f32 to vector<8x128xf32>
    %582 = arith.subf %581, %580 : vector<8x128xf32>
    %583 = arith.mulf %582, %543 : vector<8x128xf32>
    %c8_322 = arith.constant 8 : index
    %c0_323 = arith.constant 0 : index
    %c0_324 = arith.constant 0 : index
    %584 = vector.load %arg3[%c8_322, %c0_323, %c0_324] : memref<16x8x128xf32, #tpu.memory_space<vmem>>, vector<1x8x128xf32>
    %585 = vector.shape_cast %584 : vector<1x8x128xf32> to vector<8x128xf32>
    %586 = vector.shape_cast %583 : vector<8x128xf32> to vector<1x8x128xf32>
    tpu.vector_store %arg3[%c8_322, %c0_323, %c0_324], %586 {strides = array<i32>} : memref<16x8x128xf32, #tpu.memory_space<vmem>>, vector<1x8x128xf32>,
    %587 = arith.addf %521, %583 : vector<8x128xf32>
    %588 = arith.mulf %583, %557 : vector<8x128xf32>
    %589 = arith.addf %523, %588 : vector<8x128xf32>
    %590 = arith.addf %483, %549 : vector<8x128xf32>
    %cst_325 = arith.constant 5.000000e-01 : f32
    %591 = vector.broadcast %cst_325 : f32 to vector<8x128xf32>
    %592 = arith.mulf %590, %591 : vector<8x128xf32>
    %593 = arith.mulf %583, %592 : vector<8x128xf32>
    %594 = arith.addf %528, %593 : vector<8x128xf32>
    %595 = arith.addf %485, %551 : vector<8x128xf32>
    %cst_326 = arith.constant 5.000000e-01 : f32
    %596 = vector.broadcast %cst_326 : f32 to vector<8x128xf32>
    %597 = arith.mulf %595, %596 : vector<8x128xf32>
    %598 = arith.mulf %583, %597 : vector<8x128xf32>
    %599 = arith.addf %533, %598 : vector<8x128xf32>
    %600 = arith.addf %487, %553 : vector<8x128xf32>
    %cst_327 = arith.constant 5.000000e-01 : f32
    %601 = vector.broadcast %cst_327 : f32 to vector<8x128xf32>
    %602 = arith.mulf %600, %601 : vector<8x128xf32>
    %603 = arith.mulf %583, %602 : vector<8x128xf32>
    %604 = arith.addf %538, %603 : vector<8x128xf32>
    %cst_328 = arith.constant 1.000000e+00 : f32
    %605 = vector.broadcast %cst_328 : f32 to vector<8x128xf32>
    %606 = arith.subf %605, %582 : vector<8x128xf32>
    %cst_329 = arith.constant 1.000000e-10 : f32
    %607 = vector.broadcast %cst_329 : f32 to vector<8x128xf32>
    %608 = arith.addf %606, %607 : vector<8x128xf32>
    %609 = arith.mulf %543, %608 : vector<8x128xf32>
    %c0_330 = arith.constant 0 : index
    %c10 = arith.constant 10 : index
    %c0_331 = arith.constant 0 : index
    %c0_332 = arith.constant 0 : index
    %610 = vector.load %arg2[%c0_330, %c10, %c0_331, %c0_332] : memref<2x12x8x128xf32, #tpu.memory_space<vmem>>, vector<1x1x8x128xf32>
    %611 = vector.shape_cast %610 : vector<1x1x8x128xf32> to vector<8x128xf32>
    %c1_333 = arith.constant 1 : index
    %c10_334 = arith.constant 10 : index
    %c0_335 = arith.constant 0 : index
    %c0_336 = arith.constant 0 : index
    %612 = vector.load %arg2[%c1_333, %c10_334, %c0_335, %c0_336] : memref<2x12x8x128xf32, #tpu.memory_space<vmem>>, vector<1x1x8x128xf32>
    %613 = vector.shape_cast %612 : vector<1x1x8x128xf32> to vector<8x128xf32>
    %c0_337 = arith.constant 0 : index
    %c10_338 = arith.constant 10 : index
    %c0_339 = arith.constant 0 : index
    %c0_340 = arith.constant 0 : index
    %614 = vector.load %arg1[%c0_337, %c10_338, %c0_339, %c0_340] : memref<3x12x8x128xf32, #tpu.memory_space<vmem>>, vector<1x1x8x128xf32>
    %615 = vector.shape_cast %614 : vector<1x1x8x128xf32> to vector<8x128xf32>
    %c1_341 = arith.constant 1 : index
    %c10_342 = arith.constant 10 : index
    %c0_343 = arith.constant 0 : index
    %c0_344 = arith.constant 0 : index
    %616 = vector.load %arg1[%c1_341, %c10_342, %c0_343, %c0_344] : memref<3x12x8x128xf32, #tpu.memory_space<vmem>>, vector<1x1x8x128xf32>
    %617 = vector.shape_cast %616 : vector<1x1x8x128xf32> to vector<8x128xf32>
    %c2_345 = arith.constant 2 : index
    %c10_346 = arith.constant 10 : index
    %c0_347 = arith.constant 0 : index
    %c0_348 = arith.constant 0 : index
    %618 = vector.load %arg1[%c2_345, %c10_346, %c0_347, %c0_348] : memref<3x12x8x128xf32, #tpu.memory_space<vmem>>, vector<1x1x8x128xf32>
    %619 = vector.shape_cast %618 : vector<1x1x8x128xf32> to vector<8x128xf32>
    %620 = arith.subf %613, %547 : vector<8x128xf32>
    %621 = arith.addf %547, %613 : vector<8x128xf32>
    %cst_349 = arith.constant 5.000000e-01 : f32
    %622 = vector.broadcast %cst_349 : f32 to vector<8x128xf32>
    %623 = arith.mulf %621, %622 : vector<8x128xf32>
    %624 = arith.addf %545, %611 : vector<8x128xf32>
    %cst_350 = arith.constant 5.000000e-01 : f32
    %625 = vector.broadcast %cst_350 : f32 to vector<8x128xf32>
    %626 = arith.mulf %624, %625 : vector<8x128xf32>
    %cst_351 = arith.constant 1.000000e+00 : f32
    %627 = vector.broadcast %cst_351 : f32 to vector<8x128xf32>
    %628 = arith.subf %626, %627 : vector<8x128xf32>
    %cst_352 = arith.constant 0.000000e+00 : f32
    %629 = vector.broadcast %cst_352 : f32 to vector<8x128xf32>
    %630 = arith.maximumf %628, %629 : vector<8x128xf32>
    %631 = vector.broadcast %cst_352 : f32 to vector<8x128xf32>
    %632 = arith.subf %628, %631 : vector<8x128xf32>
    %633 = arith.cmpf one, %632, %632 : vector<8x128xf32>
    %634 = vector.broadcast %cst_352 : f32 to vector<8x128xf32>
    %635 = arith.addf %628, %634 : vector<8x128xf32>
    %636 = math.absf %632 : vector<8x128xf32>
    %cst_353 = arith.constant 0.000000e+00 : f32
    %637 = vector.broadcast %cst_353 : f32 to vector<8x128xf32>
    %638 = arith.subf %637, %636 : vector<8x128xf32>
    %639 = math.exp %638 : vector<8x128xf32>
    %640 = math.log1p %639 : vector<8x128xf32>
    %641 = arith.addf %630, %640 : vector<8x128xf32>
    %642 = arith.select %633, %635, %641 : vector<8x128xi1>, vector<8x128xf32>
    %cst_354 = arith.constant 0.000000e+00 : f32
    %643 = vector.broadcast %cst_354 : f32 to vector<8x128xf32>
    %644 = arith.subf %643, %642 : vector<8x128xf32>
    %645 = arith.mulf %644, %620 : vector<8x128xf32>
    %646 = math.exp %645 : vector<8x128xf32>
    %cst_355 = arith.constant 1.000000e+00 : f32
    %647 = vector.broadcast %cst_355 : f32 to vector<8x128xf32>
    %648 = arith.subf %647, %646 : vector<8x128xf32>
    %649 = arith.mulf %648, %609 : vector<8x128xf32>
    %c9_356 = arith.constant 9 : index
    %c0_357 = arith.constant 0 : index
    %c0_358 = arith.constant 0 : index
    %650 = vector.load %arg3[%c9_356, %c0_357, %c0_358] : memref<16x8x128xf32, #tpu.memory_space<vmem>>, vector<1x8x128xf32>
    %651 = vector.shape_cast %650 : vector<1x8x128xf32> to vector<8x128xf32>
    %652 = vector.shape_cast %649 : vector<8x128xf32> to vector<1x8x128xf32>
    tpu.vector_store %arg3[%c9_356, %c0_357, %c0_358], %652 {strides = array<i32>} : memref<16x8x128xf32, #tpu.memory_space<vmem>>, vector<1x8x128xf32>,
    %653 = arith.addf %587, %649 : vector<8x128xf32>
    %654 = arith.mulf %649, %623 : vector<8x128xf32>
    %655 = arith.addf %589, %654 : vector<8x128xf32>
    %656 = arith.addf %549, %615 : vector<8x128xf32>
    %cst_359 = arith.constant 5.000000e-01 : f32
    %657 = vector.broadcast %cst_359 : f32 to vector<8x128xf32>
    %658 = arith.mulf %656, %657 : vector<8x128xf32>
    %659 = arith.mulf %649, %658 : vector<8x128xf32>
    %660 = arith.addf %594, %659 : vector<8x128xf32>
    %661 = arith.addf %551, %617 : vector<8x128xf32>
    %cst_360 = arith.constant 5.000000e-01 : f32
    %662 = vector.broadcast %cst_360 : f32 to vector<8x128xf32>
    %663 = arith.mulf %661, %662 : vector<8x128xf32>
    %664 = arith.mulf %649, %663 : vector<8x128xf32>
    %665 = arith.addf %599, %664 : vector<8x128xf32>
    %666 = arith.addf %553, %619 : vector<8x128xf32>
    %cst_361 = arith.constant 5.000000e-01 : f32
    %667 = vector.broadcast %cst_361 : f32 to vector<8x128xf32>
    %668 = arith.mulf %666, %667 : vector<8x128xf32>
    %669 = arith.mulf %649, %668 : vector<8x128xf32>
    %670 = arith.addf %604, %669 : vector<8x128xf32>
    %cst_362 = arith.constant 1.000000e+00 : f32
    %671 = vector.broadcast %cst_362 : f32 to vector<8x128xf32>
    %672 = arith.subf %671, %648 : vector<8x128xf32>
    %cst_363 = arith.constant 1.000000e-10 : f32
    %673 = vector.broadcast %cst_363 : f32 to vector<8x128xf32>
    %674 = arith.addf %672, %673 : vector<8x128xf32>
    %675 = arith.mulf %609, %674 : vector<8x128xf32>
    %c0_364 = arith.constant 0 : index
    %c11 = arith.constant 11 : index
    %c0_365 = arith.constant 0 : index
    %c0_366 = arith.constant 0 : index
    %676 = vector.load %arg2[%c0_364, %c11, %c0_365, %c0_366] : memref<2x12x8x128xf32, #tpu.memory_space<vmem>>, vector<1x1x8x128xf32>
    %677 = vector.shape_cast %676 : vector<1x1x8x128xf32> to vector<8x128xf32>
    %c1_367 = arith.constant 1 : index
    %c11_368 = arith.constant 11 : index
    %c0_369 = arith.constant 0 : index
    %c0_370 = arith.constant 0 : index
    %678 = vector.load %arg2[%c1_367, %c11_368, %c0_369, %c0_370] : memref<2x12x8x128xf32, #tpu.memory_space<vmem>>, vector<1x1x8x128xf32>
    %679 = vector.shape_cast %678 : vector<1x1x8x128xf32> to vector<8x128xf32>
    %c0_371 = arith.constant 0 : index
    %c11_372 = arith.constant 11 : index
    %c0_373 = arith.constant 0 : index
    %c0_374 = arith.constant 0 : index
    %680 = vector.load %arg1[%c0_371, %c11_372, %c0_373, %c0_374] : memref<3x12x8x128xf32, #tpu.memory_space<vmem>>, vector<1x1x8x128xf32>
    %681 = vector.shape_cast %680 : vector<1x1x8x128xf32> to vector<8x128xf32>
    %c1_375 = arith.constant 1 : index
    %c11_376 = arith.constant 11 : index
    %c0_377 = arith.constant 0 : index
    %c0_378 = arith.constant 0 : index
    %682 = vector.load %arg1[%c1_375, %c11_376, %c0_377, %c0_378] : memref<3x12x8x128xf32, #tpu.memory_space<vmem>>, vector<1x1x8x128xf32>
    %683 = vector.shape_cast %682 : vector<1x1x8x128xf32> to vector<8x128xf32>
    %c2_379 = arith.constant 2 : index
    %c11_380 = arith.constant 11 : index
    %c0_381 = arith.constant 0 : index
    %c0_382 = arith.constant 0 : index
    %684 = vector.load %arg1[%c2_379, %c11_380, %c0_381, %c0_382] : memref<3x12x8x128xf32, #tpu.memory_space<vmem>>, vector<1x1x8x128xf32>
    %685 = vector.shape_cast %684 : vector<1x1x8x128xf32> to vector<8x128xf32>
    %686 = arith.subf %679, %613 : vector<8x128xf32>
    %687 = arith.addf %613, %679 : vector<8x128xf32>
    %cst_383 = arith.constant 5.000000e-01 : f32
    %688 = vector.broadcast %cst_383 : f32 to vector<8x128xf32>
    %689 = arith.mulf %687, %688 : vector<8x128xf32>
    %690 = arith.addf %611, %677 : vector<8x128xf32>
    %cst_384 = arith.constant 5.000000e-01 : f32
    %691 = vector.broadcast %cst_384 : f32 to vector<8x128xf32>
    %692 = arith.mulf %690, %691 : vector<8x128xf32>
    %cst_385 = arith.constant 1.000000e+00 : f32
    %693 = vector.broadcast %cst_385 : f32 to vector<8x128xf32>
    %694 = arith.subf %692, %693 : vector<8x128xf32>
    %cst_386 = arith.constant 0.000000e+00 : f32
    %695 = vector.broadcast %cst_386 : f32 to vector<8x128xf32>
    %696 = arith.maximumf %694, %695 : vector<8x128xf32>
    %697 = vector.broadcast %cst_386 : f32 to vector<8x128xf32>
    %698 = arith.subf %694, %697 : vector<8x128xf32>
    %699 = arith.cmpf one, %698, %698 : vector<8x128xf32>
    %700 = vector.broadcast %cst_386 : f32 to vector<8x128xf32>
    %701 = arith.addf %694, %700 : vector<8x128xf32>
    %702 = math.absf %698 : vector<8x128xf32>
    %cst_387 = arith.constant 0.000000e+00 : f32
    %703 = vector.broadcast %cst_387 : f32 to vector<8x128xf32>
    %704 = arith.subf %703, %702 : vector<8x128xf32>
    %705 = math.exp %704 : vector<8x128xf32>
    %706 = math.log1p %705 : vector<8x128xf32>
    %707 = arith.addf %696, %706 : vector<8x128xf32>
    %708 = arith.select %699, %701, %707 : vector<8x128xi1>, vector<8x128xf32>
    %cst_388 = arith.constant 0.000000e+00 : f32
    %709 = vector.broadcast %cst_388 : f32 to vector<8x128xf32>
    %710 = arith.subf %709, %708 : vector<8x128xf32>
    %711 = arith.mulf %710, %686 : vector<8x128xf32>
    %712 = math.exp %711 : vector<8x128xf32>
    %cst_389 = arith.constant 1.000000e+00 : f32
    %713 = vector.broadcast %cst_389 : f32 to vector<8x128xf32>
    %714 = arith.subf %713, %712 : vector<8x128xf32>
    %715 = arith.mulf %714, %675 : vector<8x128xf32>
    %c10_390 = arith.constant 10 : index
    %c0_391 = arith.constant 0 : index
    %c0_392 = arith.constant 0 : index
    %716 = vector.load %arg3[%c10_390, %c0_391, %c0_392] : memref<16x8x128xf32, #tpu.memory_space<vmem>>, vector<1x8x128xf32>
    %717 = vector.shape_cast %716 : vector<1x8x128xf32> to vector<8x128xf32>
    %718 = vector.shape_cast %715 : vector<8x128xf32> to vector<1x8x128xf32>
    tpu.vector_store %arg3[%c10_390, %c0_391, %c0_392], %718 {strides = array<i32>} : memref<16x8x128xf32, #tpu.memory_space<vmem>>, vector<1x8x128xf32>,
    %719 = arith.addf %653, %715 : vector<8x128xf32>
    %720 = arith.mulf %715, %689 : vector<8x128xf32>
    %721 = arith.addf %655, %720 : vector<8x128xf32>
    %722 = arith.addf %615, %681 : vector<8x128xf32>
    %cst_393 = arith.constant 5.000000e-01 : f32
    %723 = vector.broadcast %cst_393 : f32 to vector<8x128xf32>
    %724 = arith.mulf %722, %723 : vector<8x128xf32>
    %725 = arith.mulf %715, %724 : vector<8x128xf32>
    %726 = arith.addf %660, %725 : vector<8x128xf32>
    %727 = arith.addf %617, %683 : vector<8x128xf32>
    %cst_394 = arith.constant 5.000000e-01 : f32
    %728 = vector.broadcast %cst_394 : f32 to vector<8x128xf32>
    %729 = arith.mulf %727, %728 : vector<8x128xf32>
    %730 = arith.mulf %715, %729 : vector<8x128xf32>
    %731 = arith.addf %665, %730 : vector<8x128xf32>
    %732 = arith.addf %619, %685 : vector<8x128xf32>
    %cst_395 = arith.constant 5.000000e-01 : f32
    %733 = vector.broadcast %cst_395 : f32 to vector<8x128xf32>
    %734 = arith.mulf %732, %733 : vector<8x128xf32>
    %735 = arith.mulf %715, %734 : vector<8x128xf32>
    %736 = arith.addf %670, %735 : vector<8x128xf32>
    %cst_396 = arith.constant 1.000000e-03 : f32
    %737 = vector.broadcast %cst_396 : f32 to vector<8x128xf32>
    %738 = arith.addf %719, %737 : vector<8x128xf32>
    %739 = arith.divf %721, %738 : vector<8x128xf32>
    %cst_397 = arith.constant 2.000000e+00 : f32
    %740 = vector.broadcast %cst_397 : f32 to vector<8x128xf32>
    %741 = arith.mulf %726, %740 : vector<8x128xf32>
    %cst_398 = arith.constant 1.000000e+00 : f32
    %742 = vector.broadcast %cst_398 : f32 to vector<8x128xf32>
    %743 = arith.subf %741, %742 : vector<8x128xf32>
    %c11_399 = arith.constant 11 : index
    %c0_400 = arith.constant 0 : index
    %c0_401 = arith.constant 0 : index
    %744 = vector.load %arg3[%c11_399, %c0_400, %c0_401] : memref<16x8x128xf32, #tpu.memory_space<vmem>>, vector<1x8x128xf32>
    %745 = vector.shape_cast %744 : vector<1x8x128xf32> to vector<8x128xf32>
    %746 = vector.shape_cast %743 : vector<8x128xf32> to vector<1x8x128xf32>
    tpu.vector_store %arg3[%c11_399, %c0_400, %c0_401], %746 {strides = array<i32>} : memref<16x8x128xf32, #tpu.memory_space<vmem>>, vector<1x8x128xf32>,
    %cst_402 = arith.constant 2.000000e+00 : f32
    %747 = vector.broadcast %cst_402 : f32 to vector<8x128xf32>
    %748 = arith.mulf %731, %747 : vector<8x128xf32>
    %cst_403 = arith.constant 1.000000e+00 : f32
    %749 = vector.broadcast %cst_403 : f32 to vector<8x128xf32>
    %750 = arith.subf %748, %749 : vector<8x128xf32>
    %c12 = arith.constant 12 : index
    %c0_404 = arith.constant 0 : index
    %c0_405 = arith.constant 0 : index
    %751 = vector.load %arg3[%c12, %c0_404, %c0_405] : memref<16x8x128xf32, #tpu.memory_space<vmem>>, vector<1x8x128xf32>
    %752 = vector.shape_cast %751 : vector<1x8x128xf32> to vector<8x128xf32>
    %753 = vector.shape_cast %750 : vector<8x128xf32> to vector<1x8x128xf32>
    tpu.vector_store %arg3[%c12, %c0_404, %c0_405], %753 {strides = array<i32>} : memref<16x8x128xf32, #tpu.memory_space<vmem>>, vector<1x8x128xf32>,
    %cst_406 = arith.constant 2.000000e+00 : f32
    %754 = vector.broadcast %cst_406 : f32 to vector<8x128xf32>
    %755 = arith.mulf %736, %754 : vector<8x128xf32>
    %cst_407 = arith.constant 1.000000e+00 : f32
    %756 = vector.broadcast %cst_407 : f32 to vector<8x128xf32>
    %757 = arith.subf %755, %756 : vector<8x128xf32>
    %c13 = arith.constant 13 : index
    %c0_408 = arith.constant 0 : index
    %c0_409 = arith.constant 0 : index
    %758 = vector.load %arg3[%c13, %c0_408, %c0_409] : memref<16x8x128xf32, #tpu.memory_space<vmem>>, vector<1x8x128xf32>
    %759 = vector.shape_cast %758 : vector<1x8x128xf32> to vector<8x128xf32>
    %760 = vector.shape_cast %757 : vector<8x128xf32> to vector<1x8x128xf32>
    tpu.vector_store %arg3[%c13, %c0_408, %c0_409], %760 {strides = array<i32>} : memref<16x8x128xf32, #tpu.memory_space<vmem>>, vector<1x8x128xf32>,
    %c14 = arith.constant 14 : index
    %c0_410 = arith.constant 0 : index
    %c0_411 = arith.constant 0 : index
    %761 = vector.load %arg3[%c14, %c0_410, %c0_411] : memref<16x8x128xf32, #tpu.memory_space<vmem>>, vector<1x8x128xf32>
    %762 = vector.shape_cast %761 : vector<1x8x128xf32> to vector<8x128xf32>
    %763 = vector.shape_cast %739 : vector<8x128xf32> to vector<1x8x128xf32>
    tpu.vector_store %arg3[%c14, %c0_410, %c0_411], %763 {strides = array<i32>} : memref<16x8x128xf32, #tpu.memory_space<vmem>>, vector<1x8x128xf32>,
    %c15 = arith.constant 15 : index
    %c0_412 = arith.constant 0 : index
    %c0_413 = arith.constant 0 : index
    %764 = vector.load %arg3[%c15, %c0_412, %c0_413] : memref<16x8x128xf32, #tpu.memory_space<vmem>>, vector<1x8x128xf32>
    %765 = vector.shape_cast %764 : vector<1x8x128xf32> to vector<8x128xf32>
    %766 = vector.shape_cast %719 : vector<8x128xf32> to vector<1x8x128xf32>
    tpu.vector_store %arg3[%c15, %c0_412, %c0_413], %766 {strides = array<i32>} : memref<16x8x128xf32, #tpu.memory_space<vmem>>, vector<1x8x128xf32>,
    return
  }
  func.func @transform_0(%arg0: i32) -> (i32, i32, i32, i32) {
    %c0_i32 = arith.constant 0 : i32
    %c0_i32_0 = arith.constant 0 : i32
    %c0_i32_1 = arith.constant 0 : i32
    %c0_i32_2 = arith.constant 0 : i32
    return %c0_i32, %c0_i32_0, %arg0, %c0_i32_1 : i32, i32, i32, i32
  }
  func.func @transform_1(%arg0: i32) -> (i32, i32, i32, i32) {
    %c0_i32 = arith.constant 0 : i32
    %c0_i32_0 = arith.constant 0 : i32
    %c0_i32_1 = arith.constant 0 : i32
    %c0_i32_2 = arith.constant 0 : i32
    return %c0_i32, %c0_i32_0, %arg0, %c0_i32_1 : i32, i32, i32, i32
  }
  func.func @transform_2(%arg0: i32) -> (i32, i32, i32) {
    %c0_i32 = arith.constant 0 : i32
    %c0_i32_0 = arith.constant 0 : i32
    %c0_i32_1 = arith.constant 0 : i32
    return %c0_i32, %arg0, %c0_i32_0 : i32, i32, i32
  }
}

</mosaic_0001>

<bundles_post_ra>
// kernel: tpu_custom_call.1
= control target key start
LH: loop header
LB: loop body
LE: loop exit
PB: predicated region body
PF: predicated region fallthrough
CT: control target
= control target key end

     0   :  { %7 = vsyncpa [#allocation3], 0  ;;  %s1350_s0 = inlined_call_operand.hbm [shape: f32[3,12,8,128], index: 0, kind: input, shape index: {}]   ;;  %s1351_s1 = inlined_call_operand.hbm [shape: f32[2,12,8,128], index: 1, kind: input, shape index: {}]   ;;  %s1352_s2 = inlined_call_operand.hbm [shape: f32[16,8,128], index: 2, kind: output, shape index: {}]  }
   0x1   :  { %8 = vsyncpa [#allocation6], 0 }
   0x2   :  { %9 = vsyncpa [#allocation4], 0  ;;  %s14_s11 = sshll.u32 %s1350_s0, 4  ;;  %s929_s12 = smov [#allocation2]   ;;  %s15_s11 = int_to_ptr.hbm [resolvable:$true] %s14_s11 }
   0x3   :  { %s16_s13 = sshll.u32 %s929_s12, 4  ;;  %s27_s16 = sshll.u32 %s1351_s1, 4  ;;  %s17_s13 = int_to_ptr.vmem [resolvable:$true] %s16_s13  ;;  %s28_s16 = int_to_ptr.hbm [resolvable:$true] %s27_s16 }
   0x4   :  { %s930_s17 = smov 128   ;;  %s931_s18 = smov 8  }
   0x5   :  { %22 = dma.hbm_to_vmem [thread:$0]  %s15_s11, 4608, %s17_s13, [#allocation3], %s930_s17, %s930_s17, %s931_s18  }
   0x6   :  { %s932_s19 = smov [#allocation5]  }
   0x7   :  { %s29_s20 = sshll.u32 %s932_s19, 4  ;;  %s30_s20 = int_to_ptr.vmem [resolvable:$true] %s29_s20 }
   0x8   :  { %35 = dma.hbm_to_vmem [thread:$0]  %s28_s16, 3072, %s30_s20, [#allocation6], %s930_s17, %s930_s17, %s931_s18  }
   0x9   :  { %923 = dma.done.wait [#allocation3], 4608  }
   0xa   :  { %924 = vsyncadd [#allocation3], 4294962688 }
   0xb   :  { %925 = dma.done.wait [#allocation6], 3072  }
   0xc   :  { %926 = vsyncadd [#allocation6], 4294964224  ;;  %v44_v0 = vld [vmem:[#allocation5] sm:$0xff]  ;;  %v53_v1 = vld [vmem:[#allocation5 + $0x8] sm:$0xff]  ;;  %s933_s0 = smov [#allocation7]   ;;  %s744_s23 = sshll.u32 %s1352_s2, 4  ;;  %s745_s23 = int_to_ptr.hbm [resolvable:$true] %s744_s23 }
   0xd   :  { %v65_v2 = vadd.f32 %v53_v1, %v44_v0  ;;  %v110_v3 = vld [vmem:[#allocation5 + $0x10] sm:$0xff]  ;;  %v170_v4 = vld [vmem:[#allocation5 + $0x18] sm:$0xff]  ;;  %v230_v7 = vld [vmem:[#allocation5 + $0x20] sm:$0xff]  ;;  %s742_s1 = sshll.u32 %s933_s0, 4  ;;  %s743_s1 = int_to_ptr.vmem [resolvable:$true] %s742_s1 }
   0xe   :  { %v122_v5 = vadd.f32 %v110_v3, %v53_v1  ;;  %v182_v6 = vadd.f32 %v170_v4, %v110_v3  ;;  %v290_v8 = vld [vmem:[#allocation5 + $0x28] sm:$0xff]  ;;  %v350_v9 = vld [vmem:[#allocation5 + $0x30] sm:$0xff]  ;;  %v242_v11 = vadd.f32 %v230_v7, %v170_v4  ;;  %v410_v25 = vld [vmem:[#allocation5 + $0x38] sm:$0xff] }
   0xf   :  { %v66_v10 = vmul.f32 0.5, %v65_v2  ;;  %v302_v12 = vadd.f32 %v290_v8, %v230_v7  ;;  %v362_v15 = vadd.f32 %v350_v9, %v290_v8  ;;  %v973_v30 = vld [vmem:[#allocation5 + $0x60] sm:$0xff]  ;;  %v975_v31 = vld [vmem:[#allocation5 + $0x68] sm:$0xff]  ;;  %v422_v35 = vadd.f32 %v410_v25, %v350_v9  ;;  %v979_v36 = vld [vmem:[#allocation5 + $0x70] sm:$0xff] }
  0x10   :  { %v123_v13 = vmul.f32 0.5, %v122_v5  ;;  %v183_v14 = vmul.f32 0.5, %v182_v6  ;;  %v243_v17 = vmul.f32 0.5, %v242_v11  ;;  %v983_v40 = vld [vmem:[#allocation5 + $0x78] sm:$0xff]  ;;  %v62_v42 = vsub.f32 %v975_v31, %v973_v30  ;;  %v987_v43 = vld [vmem:[#allocation5 + $0x80] sm:$0xff]  ;;  %v992_v47 = vld [vmem:[#allocation5 + $0x88] sm:$0xff] }
  0x11   :  { %v961_v16 = vadd.f32 -1.0, %v66_v10  ;;  %v303_v22 = vmul.f32 0.5, %v302_v12  ;;  %v363_v24 = vmul.f32 0.5, %v362_v15  ;;  %v119_v46 = vsub.f32 %v979_v36, %v975_v31  ;;  %v470_v53 = vld [vmem:[#allocation5 + $0x40] sm:$0xff]  ;;  %v1009_v3 = vld [vmem:[#allocation5 + $0x48] sm:$0xff] }
  0x12   :  { %v963_v18 = vadd.f32 -1.0, %v123_v13  ;;  %v965_v19 = vadd.f32 -1.0, %v183_v14  ;;  %v968_v21 = vadd.f32 -1.0, %v243_v17  ;;  %v423_v49 = vmul.f32 0.5, %v422_v35 }
  0x13   :  { %v71_v20 = vand.u32 2147483647, %v961_v16  ;;  %v977_v34 = vadd.f32 -1.0, %v303_v22  ;;  %v981_v39 = vadd.f32 -1.0, %v363_v24  ;;  %v68_v50 = vmax.f32 %v961_v16, 0.0 }
  0x14   :  { %v128_v23 = vand.u32 2147483647, %v963_v18  ;;  %v188_v27 = vand.u32 2147483647, %v965_v19  ;;  %v248_v29 = vand.u32 2147483647, %v968_v21  ;;  %v179_v51 = vsub.f32 %v983_v40, %v979_v36 }
  0x15   :  { %v72_v26 = vsub.f32 0.0, %v71_v20  ;;  %v308_v45 = vand.u32 2147483647, %v977_v34  ;;  %v368_v48 = vand.u32 2147483647, %v981_v39  ;;  %v125_v54 = vmax.f32 %v963_v18, 0.0 }
  0x16   :  { %v129_v28 = vsub.f32 0.0, %v128_v23  ;;  %v189_v33 = vsub.f32 0.0, %v188_v27  ;;  %v249_v38 = vsub.f32 0.0, %v248_v29  ;;  %v185_v55 = vmax.f32 %v965_v19, 0.0 }
  0x17   :  { %v73_v32 = vmul.f32 1.442695, %v72_v26  ;;  %v309_v52 = vsub.f32 0.0, %v308_v45  ;;  %v239_v56 = vsub.f32 %v987_v43, %v983_v40  ;;  %v369_v57 = vsub.f32 0.0, %v368_v48 }
  0x18   :  { %v130_v37 = vmul.f32 1.442695, %v129_v28  ;;  %v190_v41 = vmul.f32 1.442695, %v189_v33  ;;  %v250_v44 = vmul.f32 1.442695, %v249_v38  ;;  %v299_v59 = vsub.f32 %v992_v47, %v987_v43 }
  0x19   :  { %777 = vpow2.f32 %v73_v32  ;;  %v245_v58 = vmax.f32 %v968_v21, 0.0  ;;  %v305_v60 = vmax.f32 %v977_v34, 0.0  ;;  %v310_v61 = vmul.f32 1.442695, %v309_v52 }
  0x1a   :  { %779 = vpow2.f32 %v130_v37  ;;  %v365_v63 = vmax.f32 %v981_v39, 0.0  ;;  %v370_v0 = vmul.f32 1.442695, %v369_v57  ;;  %v1007_v1 = vadd.f32 -1.0, %v423_v49 }
  0x1b   :  { %781 = vpow2.f32 %v190_v41  ;;  %v482_v2 = vadd.f32 %v470_v53, %v410_v25  ;;  %v1012_v15 = vadd.f32 %v1009_v3, %v470_v53  ;;  %vm69_vm0 = vcmp.ne.f32.partialorder %v961_v16, %v961_v16 }
  0x1c   :  { %783 = vpow2.f32 %v250_v44  ;;  %v428_v22 = vand.u32 2147483647, %v1007_v1  ;;  %vm126_vm1 = vcmp.ne.f32.partialorder %v963_v18, %v963_v18  ;;  %vm186_vm4 = vcmp.ne.f32.partialorder %v965_v19, %v965_v19 }
  0x1d   :  { %785 = vpow2.f32 %v310_v61  ;;  %v483_v25 = vmul.f32 0.5, %v482_v2  ;;  %vm246_vm6 = vcmp.ne.f32.partialorder %v968_v21, %v968_v21  ;;  %vm306_vm8 = vcmp.ne.f32.partialorder %v977_v34, %v977_v34 }
  0x1e   :  { %787 = vpow2.f32 %v370_v0  ;;  %v429_v48 = vsub.f32 0.0, %v428_v22  ;;  %vm366_vm10 = vcmp.ne.f32.partialorder %v981_v39, %v981_v39  ;;  %vm426_vm12 = vcmp.ne.f32.partialorder %v1007_v1, %v1007_v1 }
  0x1f   :  { %v778_v62 = vpop.eup %777  ;;  %v1035_v61 = vadd.f32 -1.0, %v483_v25 }
  0x20   :  { %v780_v4 = vpop.eup %779  ;;  %v75_v5 = vadd.f32 1.0, %v778_v62  ;;  %v78_v6 = vmul.f32 -0.5, %v778_v62  ;;  %v81_v7 = vand.u32 2147483647, %v778_v62 }
  0x21   :  { %v782_v8 = vpop.eup %781  ;;  %v132_v9 = vadd.f32 1.0, %v780_v4  ;;  %v135_v10 = vmul.f32 -0.5, %v780_v4  ;;  %v138_v11 = vand.u32 2147483647, %v780_v4  ;;  %v488_v30 = vand.u32 2147483647, %v1035_v61 }
  0x22   :  { %v784_v12 = vpop.eup %783  ;;  %789 = vlog2.f32 %v75_v5  ;;  %v79_v13 = vadd.f32 1.0, %v78_v6  ;;  %v192_v14 = vadd.f32 1.0, %v782_v8  ;;  %v195_v20 = vmul.f32 -0.5, %v782_v8 }
  0x23   :  { %791 = vlog2.f32 %v132_v9  ;;  %v136_v17 = vadd.f32 1.0, %v135_v10  ;;  %v198_v23 = vand.u32 2147483647, %v782_v8  ;;  %v252_v24 = vadd.f32 1.0, %v784_v12  ;;  %v786_v32 = vpop.eup %785 }
  0x24   :  { %793 = vlog2.f32 %v192_v14  ;;  %vm1019_vm2 = vcmp.lt.f32.partialorder %v81_v7, 0.0004427343  ;;  %vm1023_vm3 = vcmp.lt.f32.partialorder %v138_v11, 0.0004427343  ;;  %v196_v28 = vadd.f32 1.0, %v195_v20  ;;  %v788_v38 = vpop.eup %787  ;;  %v590_v7 = vld [vmem:[#allocation5 + $0x50] sm:$0xff] }
  0x25   :  { %v255_v29 = vmul.f32 -0.5, %v784_v12  ;;  %v80_v33 = vmul.f32 %v778_v62, %v79_v13  ;;  %v137_v35 = vmul.f32 %v780_v4, %v136_v17  ;;  %795 = vlog2.f32 %v252_v24 }
  0x26   :  { %v258_v37 = vand.u32 2147483647, %v784_v12  ;;  %vm1029_vm5 = vcmp.lt.f32.partialorder %v198_v23, 0.0004427343  ;;  %v312_v45 = vadd.f32 1.0, %v786_v32  ;;  %v315_v52 = vmul.f32 -0.5, %v786_v32 }
  0x27   :  { %v256_v44 = vadd.f32 1.0, %v255_v29  ;;  %v372_v53 = vadd.f32 1.0, %v788_v38  ;;  %v375_v57 = vmul.f32 -0.5, %v788_v38  ;;  %v197_v2 = vmul.f32 %v782_v8, %v196_v28 }
  0x28   :  { %v790_v49 = vpop.eup %789  ;;  %797 = vlog2.f32 %v312_v45  ;;  %v318_v4 = vand.u32 2147483647, %v786_v32  ;;  %vm1037_vm7 = vcmp.lt.f32.partialorder %v258_v37, 0.0004427343  ;;  %v316_v9 = vadd.f32 1.0, %v315_v52 }
  0x29   :  { %v792_v62 = vpop.eup %791  ;;  %v77_v0 = vmul.f32 0.6931472, %v790_v49  ;;  %799 = vlog2.f32 %v372_v53  ;;  %v257_v13 = vmul.f32 %v784_v12, %v256_v44  ;;  %v376_v14 = vadd.f32 1.0, %v375_v57 }
  0x2a   :  { %v794_v5 = vpop.eup %793  ;;  %v134_v6 = vmul.f32 0.6931472, %v792_v62  ;;  %v378_v22 = vand.u32 2147483647, %v788_v38  ;;  %v430_v23 = vmul.f32 1.442695, %v429_v48  ;;  %vm486_vm15 = vcmp.ne.f32.partialorder %v1035_v61, %v1035_v61 }
  0x2b   :  { %v83_v10 = vsel %vm1019_vm2, %v80_v33, %v77_v0  ;;  %v194_v11 = vmul.f32 0.6931472, %v794_v5  ;;  %v796_v8 = vpop.eup %795  ;;  %vm1053_vm9 = vcmp.lt.f32.partialorder %v318_v4, 0.0004427343  ;;  %v377_v37 = vmul.f32 %v788_v38, %v376_v14  ;;  %v1099_v62 = vld [vmem:[#allocation5 + $0x90] sm:$0xff] }
  0x2c   :  { %v84_v17 = vadd.f32 %v83_v10, %v68_v50  ;;  %v140_v20 = vsel %vm1023_vm3, %v137_v35, %v134_v6  ;;  %v254_v26 = vmul.f32 0.6931472, %v796_v8  ;;  %801 = vpow2.f32 %v430_v23 }
  0x2d   :  { %v141_v24 = vadd.f32 %v140_v20, %v125_v54  ;;  %v200_v25 = vsel %vm1029_vm5, %v197_v2, %v194_v11  ;;  %v317_v54 = vmul.f32 %v786_v32, %v316_v9  ;;  %vm1080_vm11 = vcmp.lt.f32.partialorder %v378_v22, 0.0004427343 }
  0x2e   :  { %v85_v50 = vsel %vm69_vm0, %v961_v16, %v84_v17  ;;  %v201_v12 = vadd.f32 %v200_v25, %v185_v55  ;;  %v798_v27 = vpop.eup %797  ;;  %v260_v35 = vsel %vm1037_vm7, %v257_v13, %v254_v26  ;;  %v489_v0 = vsub.f32 0.0, %v488_v30 }
  0x2f   :  { %v86_v29 = vsub.f32 0.0, %v85_v50  ;;  %v142_v33 = vsel %vm126_vm1, %v963_v18, %v141_v24  ;;  %v800_v41 = vpop.eup %799  ;;  %v261_v55 = vadd.f32 %v260_v35, %v245_v58  ;;  %v314_v32 = vmul.f32 0.6931472, %v798_v27 }
  0x30   :  { %v143_v44 = vsub.f32 0.0, %v142_v33  ;;  %v202_v16 = vsel %vm186_vm4, %v965_v19, %v201_v12  ;;  %v374_v48 = vmul.f32 0.6931472, %v800_v41  ;;  %v543_v2 = vmul.f32 0.5, %v1012_v15 }
  0x31   :  { %v87_v45 = vmul.f32 %v86_v29, %v62_v42  ;;  %v203_v18 = vsub.f32 0.0, %v202_v16  ;;  %v262_v19 = vsel %vm246_vm6, %v968_v21, %v261_v55  ;;  %v320_v58 = vsel %vm1053_vm9, %v317_v54, %v314_v32 }
  0x32   :  { %v144_v38 = vmul.f32 %v143_v44, %v119_v46  ;;  %v263_v53 = vsub.f32 0.0, %v262_v19  ;;  %v321_v31 = vadd.f32 %v320_v58, %v305_v60  ;;  %v802_v46 = vpop.eup %801  ;;  %v380_v21 = vsel %vm1080_vm11, %v377_v37, %v374_v48 }
  0x33   :  { %v88_v42 = vmul.f32 1.442695, %v87_v45  ;;  %v204_v52 = vmul.f32 %v203_v18, %v179_v51  ;;  %v381_v5 = vadd.f32 %v380_v21, %v365_v63  ;;  %v432_v6 = vadd.f32 1.0, %v802_v46 }
  0x34   :  { %v145_v57 = vmul.f32 1.442695, %v144_v38  ;;  %v264_v36 = vmul.f32 %v263_v53, %v239_v56  ;;  %v322_v51 = vsel %vm306_vm8, %v977_v34, %v321_v31  ;;  %v359_v9 = vsub.f32 %v1099_v62, %v992_v47  ;;  %v1122_v56 = vld [vmem:[#allocation5 + $0x98] sm:$0xff] }
  0x35   :  { %803 = vpow2.f32 %v88_v42  ;;  %v205_v4 = vmul.f32 1.442695, %v204_v52  ;;  %v323_v60 = vsub.f32 0.0, %v322_v51  ;;  %v435_v10 = vmul.f32 -0.5, %v802_v46 }
  0x36   :  { %805 = vpow2.f32 %v145_v57  ;;  %v265_v15 = vmul.f32 1.442695, %v264_v36  ;;  %v382_v34 = vsel %vm366_vm10, %v981_v39, %v381_v5  ;;  %v490_v63 = vmul.f32 1.442695, %v489_v0 }
  0x37   :  { %807 = vpow2.f32 %v205_v4  ;;  %v324_v40 = vmul.f32 %v323_v60, %v299_v59  ;;  %v383_v11 = vsub.f32 0.0, %v382_v34  ;;  %v436_v13 = vadd.f32 1.0, %v435_v10 }
  0x38   :  { %809 = vlog2.f32 %v432_v6  ;;  %v602_v14 = vadd.f32 %v590_v7, %v1009_v3  ;;  %v438_v17 = vand.u32 2147483647, %v802_v46  ;;  %v1125_v20 = vadd.f32 -1.0, %v543_v2  ;;  %v650_v3 = vld [vmem:[#allocation5 + $0x58] sm:$0xff] }
  0x39   :  { %811 = vpow2.f32 %v265_v15  ;;  %v325_v8 = vmul.f32 1.442695, %v324_v40  ;;  %v384_v47 = vmul.f32 %v383_v11, %v359_v9  ;;  %v419_v59 = vsub.f32 %v1122_v56, %v1099_v62 }
  0x3a   :  { %813 = vpow2.f32 %v490_v63  ;;  %v425_v23 = vmax.f32 %v1007_v1, 0.0  ;;  %v437_v28 = vmul.f32 %v802_v46, %v436_v13  ;;  %v548_v50 = vand.u32 2147483647, %v1125_v20 }
  0x3b   :  { %v804_v43 = vpop.eup %803  ;;  %815 = vpow2.f32 %v325_v8  ;;  %v385_v26 = vmul.f32 1.442695, %v384_v47  ;;  %vm1137_vm13 = vcmp.lt.f32.partialorder %v438_v17, 0.0004427343  ;;  %v603_v33 = vmul.f32 0.5, %v602_v14 }
  0x3c   :  { %v806_v39 = vpop.eup %805  ;;  %v1129_v22 = vsub.f32 1.0, %v804_v43  ;;  %v662_v44 = vadd.f32 %v650_v3, %v590_v7  ;;  %v549_v18 = vsub.f32 0.0, %v548_v50  ;;  %v485_v15 = vmax.f32 %v1035_v61, 0.0  ;;  %v1169_v3 = vld [vmem:[#allocation5 + $0xa0] sm:$0xff] }
  0x3d   :  { %v808_v24 = vpop.eup %807  ;;  %v147_v25 = vsub.f32 1.0, %v806_v39  ;;  %817 = vpow2.f32 %v385_v26  ;;  %v1145_v57 = vadd.f32 -1.0, %v603_v33  ;;  %vm546_vm0 = vcmp.ne.f32.partialorder %v1125_v20, %v1125_v20 }
  0x3e   :  { %v810_v12 = vpop.eup %809  ;;  %91 = vst [vmem:[#allocation7] sm:$0xff] %v1129_v22  ;;  %v107_v54 = vsub.f32 1.0, %v1129_v22  ;;  %v207_v27 = vsub.f32 1.0, %v808_v24  ;;  %v550_v9 = vmul.f32 1.442695, %v549_v18  ;;  %v663_v63 = vmul.f32 0.5, %v662_v44 }
  0x3f   :  { %v812_v35 = vpop.eup %811  ;;  %v166_v37 = vsub.f32 1.0, %v147_v25  ;;  %v434_v41 = vmul.f32 0.6931472, %v810_v12  ;;  %v608_v47 = vand.u32 2147483647, %v1145_v57  ;;  %vm606_vm2 = vcmp.ne.f32.partialorder %v1145_v57, %v1145_v57 }
  0x40   :  { %v814_v16 = vpop.eup %813  ;;  %v108_v55 = vadd.f32 1e-10, %v107_v54  ;;  %v226_v32 = vsub.f32 1.0, %v207_v27  ;;  %v267_v45 = vsub.f32 1.0, %v812_v35  ;;  %v1182_v35 = vld [vmem:[#allocation5 + $0xa8] sm:$0xff] }
  0x41   :  { %v167_v48 = vadd.f32 1e-10, %v166_v37  ;;  %v440_v49 = vsel %vm1137_vm13, %v437_v28, %v434_v41  ;;  %v492_v38 = vadd.f32 1.0, %v814_v16  ;;  %v495_v19 = vmul.f32 -0.5, %v814_v16  ;;  %v816_v58 = vpop.eup %815 }
  0x42   :  { %v1143_v30 = vmul.f32 %v147_v25, %v108_v55  ;;  %v227_v42 = vadd.f32 1e-10, %v226_v32  ;;  %v286_v52 = vsub.f32 1.0, %v267_v45  ;;  %v441_v53 = vadd.f32 %v440_v49, %v425_v23 }
  0x43   :  { %v168_v31 = vmul.f32 %v167_v48, %v108_v55  ;;  %v327_v46 = vsub.f32 1.0, %v816_v58  ;;  %819 = vlog2.f32 %v492_v38  ;;  %v496_v2 = vadd.f32 1.0, %v495_v19  ;;  %v818_v36 = vpop.eup %817  ;;  %v1188_v19 = vld [vmem:[#allocation5 + $0xb8] sm:$0xff] }
  0x44   :  { %150 = vst [vmem:[#allocation7 + $0x8] sm:$0xff] %v1143_v30  ;;  %v287_v21 = vadd.f32 1e-10, %v286_v52  ;;  %v442_v0 = vsel %vm426_vm12, %v1007_v1, %v441_v53  ;;  %v498_v4 = vand.u32 2147483647, %v814_v16  ;;  %v387_v7 = vsub.f32 1.0, %v818_v36 }
  0x45   :  { %v1152_v51 = vmul.f32 %v207_v27, %v168_v31  ;;  %v228_v60 = vmul.f32 %v227_v42, %v168_v31  ;;  %v346_v5 = vsub.f32 1.0, %v327_v46  ;;  %v443_v6 = vsub.f32 0.0, %v442_v0  ;;  %v47_v36 = vld [vmem:[#allocation2] sm:$0xff] }
  0x46   :  { %v497_v11 = vmul.f32 %v814_v16, %v496_v2  ;;  %vm1158_vm14 = vcmp.lt.f32.partialorder %v498_v4, 0.0004427343  ;;  %821 = vpow2.f32 %v550_v9  ;;  %v406_v43 = vsub.f32 1.0, %v387_v7  ;;  %v1184_v16 = vld [vmem:[#allocation5 + $0xb0] sm:$0xff] }
  0x47   :  { %210 = vst [vmem:[#allocation7 + $0x10] sm:$0xff] %v1152_v51  ;;  %v1156_v10 = vmul.f32 %v267_v45, %v228_v60  ;;  %v288_v40 = vmul.f32 %v287_v21, %v228_v60  ;;  %v347_v34 = vadd.f32 1e-10, %v346_v5  ;;  %v444_v1 = vmul.f32 %v443_v6, %v419_v59  ;;  %v57_v60 = vld [vmem:[#allocation2 + $0x8] sm:$0xff]  ;;  %v114_v5 = vld [vmem:[#allocation2 + $0x10] sm:$0xff] }
  0x48   :  { %v609_v24 = vsub.f32 0.0, %v608_v47  ;;  %v1171_v25 = vadd.f32 -1.0, %v663_v63  ;;  %v407_v28 = vadd.f32 1e-10, %v406_v43  ;;  %v479_v27 = vsub.f32 %v1169_v3, %v1122_v56 }
  0x49   :  { %v820_v14 = vpop.eup %819  ;;  %270 = vst [vmem:[#allocation7 + $0x18] sm:$0xff] %v1156_v10  ;;  %v1163_v8 = vmul.f32 %v327_v46, %v288_v40  ;;  %v348_v17 = vmul.f32 %v347_v34, %v288_v40  ;;  %v445_v39 = vmul.f32 1.442695, %v444_v1  ;;  %v539_v49 = vsub.f32 %v1182_v35, %v1169_v3  ;;  %v49_v40 = vld [vmem:[#allocation2 + $0x60] sm:$0xff]  ;;  %v1205_v34 = vld [vmem:[#allocation2 + $0x68] sm:$0xff] }
  0x4a   :  { %v494_v23 = vmul.f32 0.6931472, %v820_v14  ;;  %v610_v12 = vmul.f32 1.442695, %v609_v24  ;;  %v668_v29 = vand.u32 2147483647, %v1171_v25  ;;  %v599_v52 = vsub.f32 %v1184_v16, %v1182_v35 }
  0x4b   :  { %330 = vst [vmem:[#allocation7 + $0x20] sm:$0xff] %v1163_v8  ;;  %v1167_v59 = vmul.f32 %v387_v7, %v348_v17  ;;  %823 = vpow2.f32 %v445_v39  ;;  %v408_v32 = vmul.f32 %v407_v28, %v348_v17  ;;  %v545_v42 = vmax.f32 %v1125_v20, 0.0  ;;  %v174_v14 = vld [vmem:[#allocation2 + $0x18] sm:$0xff] }
  0x4c   :  { %v500_v26 = vsel %vm1158_vm14, %v497_v11, %v494_v23  ;;  %v822_v54 = vpop.eup %821  ;;  %825 = vpow2.f32 %v610_v12  ;;  %v669_v55 = vsub.f32 0.0, %v668_v29  ;;  %v605_v31 = vmax.f32 %v1145_v57, 0.0 }
  0x4d   :  { %390 = vst [vmem:[#allocation7 + $0x28] sm:$0xff] %v1167_v59  ;;  %v501_v50 = vadd.f32 %v500_v26, %v485_v15  ;;  %v552_v37 = vadd.f32 1.0, %v822_v54  ;;  %v555_v41 = vmul.f32 -0.5, %v822_v54  ;;  %v558_v45 = vand.u32 2147483647, %v822_v54 }
  0x4e   :  { %v665_v46 = vmax.f32 %v1171_v25, 0.0  ;;  %v659_v4 = vsub.f32 %v1188_v19, %v1184_v16  ;;  %v95_v15 = vadd.f32 %v57_v60, %v47_v36  ;;  %v154_v9 = vadd.f32 %v114_v5, %v57_v60 }
  0x4f   :  { %v502_v33 = vsel %vm486_vm15, %v1035_v61, %v501_v50  ;;  %827 = vlog2.f32 %v552_v37  ;;  %v556_v38 = vadd.f32 1.0, %v555_v41  ;;  %v670_v61 = vmul.f32 1.442695, %v669_v55  ;;  %v234_v50 = vld [vmem:[#allocation2 + $0x20] sm:$0xff] }
  0x50   :  { %v503_v44 = vsub.f32 0.0, %v502_v33  ;;  %vm1199_vm1 = vcmp.lt.f32.partialorder %v558_v45, 0.0004427343  ;;  %v1209_v17 = vadd.f32 %v1205_v34, %v49_v40  ;;  %v96_v39 = vmul.f32 0.5, %v95_v15 }
  0x51   :  { %v824_v18 = vpop.eup %823  ;;  %829 = vpow2.f32 %v670_v61  ;;  %v557_v7 = vmul.f32 %v822_v54, %v556_v38  ;;  %v155_v23 = vmul.f32 0.5, %v154_v9  ;;  %v214_v28 = vadd.f32 %v174_v14, %v114_v5  ;;  %v294_v61 = vld [vmem:[#allocation2 + $0x28] sm:$0xff]  ;;  %v354_v5 = vld [vmem:[#allocation2 + $0x30] sm:$0xff] }
  0x52   :  { %v504_v48 = vmul.f32 %v503_v44, %v479_v27  ;;  %v447_v58 = vsub.f32 1.0, %v824_v18  ;;  %v826_v6 = vpop.eup %825  ;;  %v97_v29 = vmul.f32 %v96_v39, %v1129_v22  ;;  %v274_v38 = vadd.f32 %v234_v50, %v174_v14 }
  0x53   :  { %v612_v11 = vadd.f32 1.0, %v826_v6  ;;  %v615_v13 = vmul.f32 -0.5, %v826_v6  ;;  %v618_v47 = vand.u32 2147483647, %v826_v6  ;;  %v156_v33 = vmul.f32 %v155_v23, %v1143_v30 }
  0x54   :  { %v505_v53 = vmul.f32 1.442695, %v504_v48  ;;  %v1197_v21 = vmul.f32 %v447_v58, %v408_v32  ;;  %v466_v0 = vsub.f32 1.0, %v447_v58  ;;  %v215_v48 = vmul.f32 0.5, %v214_v28 }
  0x55   :  { %v828_v63 = vpop.eup %827  ;;  %v616_v26 = vadd.f32 1.0, %v615_v13  ;;  %vm1215_vm3 = vcmp.lt.f32.partialorder %v618_v47, 0.0004427343  ;;  %v157_v18 = vadd.f32 %v156_v33, %v97_v29  ;;  %vm666_vm4 = vcmp.ne.f32.partialorder %v1171_v25, %v1171_v25 }
  0x56   :  { %831 = vpow2.f32 %v505_v53  ;;  %450 = vst [vmem:[#allocation7 + $0x30] sm:$0xff] %v1197_v21  ;;  %v467_v1 = vadd.f32 1e-10, %v466_v0  ;;  %v554_v43 = vmul.f32 0.6931472, %v828_v63  ;;  %v216_v36 = vmul.f32 %v215_v48, %v1152_v51  ;;  %v474_v63 = vld [vmem:[#allocation2 + $0x40] sm:$0xff] }
  0x57   :  { %833 = vlog2.f32 %v612_v11  ;;  %v830_v12 = vpop.eup %829  ;;  %v617_v41 = vmul.f32 %v826_v6, %v616_v26  ;;  %v275_v60 = vmul.f32 0.5, %v274_v38  ;;  %v414_v6 = vld [vmem:[#allocation2 + $0x38] sm:$0xff]  ;;  %v334_v40 = vadd.f32 %v294_v61, %v234_v50 }
  0x58   :  { %v468_v24 = vmul.f32 %v467_v1, %v408_v32  ;;  %v560_v54 = vsel %vm1199_vm1, %v557_v7, %v554_v43  ;;  %v672_v44 = vadd.f32 1.0, %v830_v12  ;;  %v675_v55 = vmul.f32 -0.5, %v830_v12  ;;  %v654_v38 = vld [vmem:[#allocation2 + $0x58] sm:$0xff] }
  0x59   :  { %v561_v37 = vadd.f32 %v560_v54, %v545_v42  ;;  %v678_v45 = vand.u32 2147483647, %v830_v12  ;;  %v217_v13 = vadd.f32 %v216_v36, %v157_v18  ;;  %v276_v14 = vmul.f32 %v275_v60, %v1156_v10  ;;  %v534_v54 = vld [vmem:[#allocation2 + $0x48] sm:$0xff]  ;;  %v594_v18 = vld [vmem:[#allocation2 + $0x50] sm:$0xff] }
  0x5a   :  { %835 = vlog2.f32 %v672_v44  ;;  %v676_v0 = vadd.f32 1.0, %v675_v55  ;;  %v335_v47 = vmul.f32 0.5, %v334_v40  ;;  %v394_v39 = vadd.f32 %v354_v5, %v294_v61  ;;  %v116_v61 = vld [vmem:[#allocation2 + $0x70] sm:$0xff] }
  0x5b   :  { %v562_v53 = vsel %vm546_vm0, %v1125_v20, %v561_v37  ;;  %vm1227_vm5 = vcmp.lt.f32.partialorder %v678_v45, 0.0004427343  ;;  %v454_v23 = vadd.f32 %v414_v6, %v354_v5  ;;  %v277_v50 = vadd.f32 %v276_v14, %v217_v13 }
  0x5c   :  { %v832_v32 = vpop.eup %831  ;;  %v563_v2 = vsub.f32 0.0, %v562_v53  ;;  %v677_v20 = vmul.f32 %v830_v12, %v676_v0  ;;  %v514_v12 = vadd.f32 %v474_v63, %v414_v6  ;;  %v336_v37 = vmul.f32 %v335_v47, %v1163_v8 }
  0x5d   :  { %v507_v58 = vsub.f32 1.0, %v832_v32  ;;  %v834_v7 = vpop.eup %833  ;;  %v395_v44 = vmul.f32 0.5, %v394_v39  ;;  %v455_v32 = vmul.f32 0.5, %v454_v23  ;;  %v574_v48 = vadd.f32 %v534_v54, %v474_v63 }
  0x5e   :  { %v564_v1 = vmul.f32 %v563_v2, %v539_v49  ;;  %v614_v11 = vmul.f32 0.6931472, %v834_v7  ;;  %v515_v45 = vmul.f32 0.5, %v514_v12  ;;  %v176_v2 = vld [vmem:[#allocation2 + $0x78] sm:$0xff]  ;;  %v634_v5 = vadd.f32 %v594_v18, %v534_v54 }
  0x5f   :  { %v1232_v15 = vmul.f32 %v507_v58, %v468_v24  ;;  %v526_v9 = vsub.f32 1.0, %v507_v58  ;;  %v456_v53 = vmul.f32 %v455_v32, %v1197_v21  ;;  %v694_v7 = vadd.f32 %v654_v38, %v594_v18  ;;  %v416_v12 = vld [vmem:[#allocation2 + $0x98] sm:$0xff]  ;;  %v596_v38 = vld [vmem:[#allocation2 + $0xb0] sm:$0xff] }
  0x60   :  { %v565_v26 = vmul.f32 1.442695, %v564_v1  ;;  %v620_v28 = vsel %vm1215_vm3, %v617_v41, %v614_v11  ;;  %v836_v29 = vpop.eup %835  ;;  %v337_v41 = vadd.f32 %v336_v37, %v277_v50  ;;  %v158_v42 = vadd.f32 %v116_v61, %v1205_v34  ;;  %v236_v1 = vld [vmem:[#allocation2 + $0x80] sm:$0xff]  ;;  %v296_v11 = vld [vmem:[#allocation2 + $0x88] sm:$0xff] }
  0x61   :  { %510 = vst [vmem:[#allocation7 + $0x38] sm:$0xff] %v1232_v15  ;;  %v527_v43 = vadd.f32 1e-10, %v526_v9  ;;  %v621_v49 = vadd.f32 %v620_v28, %v605_v31  ;;  %v674_v55 = vmul.f32 0.6931472, %v836_v29  ;;  %v516_v0 = vmul.f32 %v515_v45, %v1232_v15 }
  0x62   :  { %837 = vpow2.f32 %v565_v26  ;;  %v100_v9 = vmul.f32 0.5, %v1209_v17  ;;  %v1266_v63 = vmul.f32 0.5, %v634_v5  ;;  %v159_v39 = vmul.f32 0.5, %v158_v42  ;;  %v356_v26 = vld [vmem:[#allocation2 + $0x90] sm:$0xff]  ;;  %v51_v5 = vld [vmem:[#allocation2 + $0xc0] sm:$0xff] }
  0x63   :  { %v1241_v33 = vmul.f32 %v527_v43, %v468_v24  ;;  %v622_v27 = vsel %vm606_vm2, %v1145_v57, %v621_v49  ;;  %v396_v24 = vmul.f32 %v395_v44, %v1167_v59  ;;  %v680_v58 = vsel %vm1227_vm5, %v677_v20, %v674_v55 }
  0x64   :  { %v623_v31 = vsub.f32 0.0, %v622_v27  ;;  %v681_v36 = vadd.f32 %v680_v58, %v665_v46  ;;  %v575_v57 = vmul.f32 0.5, %v574_v48  ;;  %v218_v46 = vadd.f32 %v176_v2, %v116_v61  ;;  %v536_v48 = vld [vmem:[#allocation2 + $0xa8] sm:$0xff] }
  0x65   :  { %v397_v60 = vadd.f32 %v396_v24, %v337_v41  ;;  %v101_v17 = vmul.f32 %v100_v9, %v1129_v22  ;;  %v278_v28 = vadd.f32 %v236_v1, %v176_v2  ;;  %v338_v50 = vadd.f32 %v296_v11, %v236_v1  ;;  %v476_v24 = vld [vmem:[#allocation2 + $0xa0] sm:$0xff] }
  0x66   :  { %v624_v6 = vmul.f32 %v623_v31, %v599_v52  ;;  %v682_v20 = vsel %vm666_vm4, %v1171_v25, %v681_v36  ;;  %v1268_v52 = vmul.f32 0.5, %v694_v7  ;;  %v219_v23 = vmul.f32 0.5, %v218_v46 }
  0x67   :  { %v457_v40 = vadd.f32 %v456_v53, %v397_v60  ;;  %v683_v43 = vsub.f32 0.0, %v682_v20  ;;  %v160_v49 = vmul.f32 %v159_v39, %v1143_v30  ;;  %v279_v55 = vmul.f32 0.5, %v278_v28  ;;  %v656_v53 = vld [vmem:[#allocation2 + $0xb8] sm:$0xff] }
  0x68   :  { %v838_v13 = vpop.eup %837  ;;  %v625_v14 = vmul.f32 1.442695, %v624_v6  ;;  %v220_v37 = vmul.f32 %v219_v23, %v1152_v51  ;;  %v339_v32 = vmul.f32 0.5, %v338_v50  ;;  %v398_v45 = vadd.f32 %v356_v26, %v296_v11  ;;  %v61_v6 = vld [vmem:[#allocation2 + $0xc8] sm:$0xff] }
  0x69   :  { %v567_v47 = vsub.f32 1.0, %v838_v13  ;;  %v517_v34 = vadd.f32 %v516_v0, %v457_v40  ;;  %v684_v25 = vmul.f32 %v683_v43, %v659_v4  ;;  %v161_v27 = vadd.f32 %v160_v49, %v101_v17  ;;  %v118_v13 = vld [vmem:[#allocation2 + $0xd0] sm:$0xff]  ;;  %v238_v49 = vld [vmem:[#allocation2 + $0xe0] sm:$0xff] }
  0x6a   :  { %839 = vpow2.f32 %v625_v14  ;;  %v458_v41 = vadd.f32 %v416_v12, %v356_v26  ;;  %v280_v61 = vmul.f32 %v279_v55, %v1156_v10  ;;  %v340_v31 = vmul.f32 %v339_v32, %v1163_v8  ;;  %v178_v26 = vld [vmem:[#allocation2 + $0xd8] sm:$0xff] }
  0x6b   :  { %v1275_v54 = vmul.f32 %v567_v47, %v1241_v33  ;;  %v586_v29 = vsub.f32 1.0, %v567_v47  ;;  %v685_v44 = vmul.f32 1.442695, %v684_v25  ;;  %v399_v58 = vmul.f32 0.5, %v398_v45  ;;  %v298_v45 = vld [vmem:[#allocation2 + $0xe8] sm:$0xff] }
  0x6c   :  { %v221_v36 = vadd.f32 %v220_v37, %v161_v27  ;;  %v459_v60 = vmul.f32 0.5, %v458_v41  ;;  %v518_v9 = vadd.f32 %v476_v24, %v416_v12  ;;  %v578_v42 = vadd.f32 %v536_v48, %v476_v24 }
  0x6d   :  { %570 = vst [vmem:[#allocation7 + $0x40] sm:$0xff] %v1275_v54  ;;  %v587_v18 = vadd.f32 1e-10, %v586_v29  ;;  %v576_v4 = vmul.f32 %v575_v57, %v1275_v54  ;;  %841 = vpow2.f32 %v685_v44  ;;  %v400_v7 = vmul.f32 %v399_v58, %v1167_v59 }
  0x6e   :  { %v638_v20 = vadd.f32 %v596_v38, %v536_v48  ;;  %v281_v46 = vadd.f32 %v280_v61, %v221_v36  ;;  %v460_v1 = vmul.f32 %v459_v60, %v1197_v21  ;;  %v698_v11 = vadd.f32 %v656_v53, %v596_v38  ;;  %v418_v48 = vld [vmem:[#allocation2 + $0xf8] sm:$0xff] }
  0x6f   :  { %v588_v0 = vmul.f32 %v587_v18, %v1241_v33  ;;  %v577_v2 = vadd.f32 %v576_v4, %v517_v34  ;;  %v519_v14 = vmul.f32 0.5, %v518_v9  ;;  %v579_v43 = vmul.f32 0.5, %v578_v42  ;;  %v358_v18 = vld [vmem:[#allocation2 + $0xf0] sm:$0xff] }
  0x70   :  { %v840_v57 = vpop.eup %839  ;;  %v639_v33 = vmul.f32 0.5, %v638_v20  ;;  %v103_v17 = vadd.f32 %v61_v6, %v51_v5  ;;  %v341_v39 = vadd.f32 %v340_v31, %v281_v46  ;;  %v699_v23 = vmul.f32 0.5, %v698_v11  ;;  %v478_v46 = vld [vmem:[#allocation2 + $0x100] sm:$0xff] }
  0x71   :  { %v627_v40 = vsub.f32 1.0, %v840_v57  ;;  %v520_v28 = vmul.f32 %v519_v14, %v1232_v15  ;;  %v580_v50 = vmul.f32 %v579_v43, %v1275_v54  ;;  %v162_v29 = vadd.f32 %v118_v13, %v61_v6  ;;  %v598_v14 = vld [vmem:[#allocation2 + $0x110] sm:$0xff]  ;;  %v658_v43 = vld [vmem:[#allocation2 + $0x118] sm:$0xff] }
  0x72   :  { %v104_v12 = vmul.f32 0.5, %v103_v17  ;;  %v401_v32 = vadd.f32 %v400_v7, %v341_v39  ;;  %v222_v24 = vadd.f32 %v178_v26, %v118_v13  ;;  %v282_v58 = vadd.f32 %v238_v49, %v178_v26 }
  0x73   :  { %v1286_v47 = vmul.f32 %v627_v40, %v588_v0  ;;  %v646_v34 = vsub.f32 1.0, %v627_v40  ;;  %v842_v25 = vpop.eup %841  ;;  %v163_v41 = vmul.f32 0.5, %v162_v29  ;;  %v342_v60 = vadd.f32 %v298_v45, %v238_v49 }
  0x74   :  { %v687_v44 = vsub.f32 1.0, %v842_v25  ;;  %v105_v27 = vmul.f32 %v104_v12, %v1129_v22  ;;  %v461_v31 = vadd.f32 %v460_v1, %v401_v32  ;;  %v223_v36 = vmul.f32 0.5, %v222_v24 }
  0x75   :  { %630 = vst [vmem:[#allocation7 + $0x48] sm:$0xff] %v1286_v47  ;;  %v647_v37 = vadd.f32 1e-10, %v646_v34  ;;  %v636_v55 = vmul.f32 %v1266_v63, %v1286_v47  ;;  %v640_v4 = vmul.f32 %v639_v33, %v1286_v47  ;;  %v164_v53 = vmul.f32 %v163_v41, %v1143_v30  ;;  %v846_v41 = vld [vmem:[#allocation5 + $0x68] sm:$0xff] }
  0x76   :  { %v402_v5 = vadd.f32 %v358_v18, %v298_v45  ;;  %v521_v6 = vadd.f32 %v520_v28, %v461_v31  ;;  %v283_v57 = vmul.f32 0.5, %v282_v58  ;;  %v462_v7 = vadd.f32 %v418_v48, %v358_v18 }
  0x77   :  { %v648_v38 = vmul.f32 %v647_v37, %v588_v0  ;;  %v637_v61 = vadd.f32 %v636_v55, %v577_v2  ;;  %v165_v9 = vadd.f32 %v164_v53, %v105_v27  ;;  %v224_v42 = vmul.f32 %v223_v36, %v1152_v51  ;;  %v538_v0 = vld [vmem:[#allocation2 + $0x108] sm:$0xff]  ;;  %v845_v27 = vld [vmem:[#allocation5 + $0x60] sm:$0xff] }
  0x78   :  { %v343_v20 = vmul.f32 0.5, %v342_v60  ;;  %v403_v40 = vmul.f32 0.5, %v402_v5  ;;  %v581_v1 = vadd.f32 %v580_v50, %v521_v6  ;;  %v284_v13 = vmul.f32 %v283_v57, %v1156_v10  ;;  %v847_v5 = vld [vmem:[#allocation5 + $0x70] sm:$0xff]  ;;  %v848_v57 = vld [vmem:[#allocation5 + $0x78] sm:$0xff] }
  0x79   :  { %v1296_v63 = vmul.f32 %v687_v44, %v648_v38  ;;  %v151_v33 = vadd.f32 %v1143_v30, %v1129_v22  ;;  %v225_v17 = vadd.f32 %v224_v42, %v165_v9  ;;  %v463_v39 = vmul.f32 0.5, %v462_v7  ;;  %v849_v9 = vld [vmem:[#allocation5 + $0x80] sm:$0xff] }
  0x7a   :  { %v344_v34 = vmul.f32 %v343_v20, %v1163_v8  ;;  %v641_v25 = vadd.f32 %v640_v4, %v581_v1  ;;  %v522_v28 = vadd.f32 %v478_v46, %v418_v48  ;;  %v582_v12 = vadd.f32 %v538_v0, %v478_v46 }
  0x7b   :  { %690 = vst [vmem:[#allocation7 + $0x50] sm:$0xff] %v1296_v63  ;;  %v696_v2 = vmul.f32 %v1268_v52, %v1296_v63  ;;  %v700_v11 = vmul.f32 %v699_v23, %v1296_v63  ;;  %v285_v29 = vadd.f32 %v284_v13, %v225_v17  ;;  %v404_v52 = vmul.f32 %v403_v40, %v1167_v59 }
  0x7c   :  { %v642_v50 = vadd.f32 %v598_v14, %v538_v0  ;;  %v702_v23 = vadd.f32 %v658_v43, %v598_v14  ;;  %v523_v44 = vmul.f32 0.5, %v522_v28  ;;  %v583_v55 = vmul.f32 0.5, %v582_v12  ;;  %v850_v0 = vld [vmem:[#allocation5 + $0x88] sm:$0xff] }
  0x7d   :  { %v697_v26 = vadd.f32 %v696_v2, %v637_v61  ;;  %v701_v37 = vadd.f32 %v700_v11, %v641_v25  ;;  %v211_v32 = vadd.f32 %v1152_v51, %v151_v33  ;;  %v345_v45 = vadd.f32 %v344_v34, %v285_v29 }
  0x7e   :  { %v464_v18 = vmul.f32 %v463_v39, %v1197_v21  ;;  %v63_v24 = vadd.f32 %v846_v41, %v845_v27  ;;  %v643_v38 = vmul.f32 0.5, %v642_v50  ;;  %v703_v61 = vmul.f32 0.5, %v702_v23 }
  0x7f   :  { %v722_v49 = vmul.f32 2.0, %v697_v26  ;;  %v726_v48 = vmul.f32 2.0, %v701_v37  ;;  %v405_v31 = vadd.f32 %v404_v52, %v345_v45  ;;  %v524_v58 = vmul.f32 %v523_v44, %v1232_v15 }
  0x80   :  { %v584_v53 = vmul.f32 %v583_v55, %v1275_v54  ;;  %v64_v36 = vmul.f32 0.5, %v63_v24  ;;  %v120_v6 = vadd.f32 %v847_v5, %v846_v41  ;;  %v180_v7 = vadd.f32 %v848_v57, %v847_v5 }
  0x81   :  { %v769_v4 = vadd.f32 -1.0, %v722_v49  ;;  %v770_v60 = vadd.f32 -1.0, %v726_v48  ;;  %v240_v42 = vadd.f32 %v849_v9, %v848_v57  ;;  %v465_v20 = vadd.f32 %v464_v18, %v405_v31 }
  0x82   :  { %v93_v40 = vmul.f32 %v1129_v22, %v64_v36  ;;  %v271_v46 = vadd.f32 %v1156_v10, %v211_v32  ;;  %v300_v2 = vadd.f32 %v850_v0, %v849_v9  ;;  %v121_v1 = vmul.f32 0.5, %v120_v6 }
  0x83   :  { %725 = vst [vmem:[#allocation7 + $0x58] sm:$0xff] %v769_v4  ;;  %v181_v11 = vmul.f32 0.5, %v180_v7  ;;  %v241_v13 = vmul.f32 0.5, %v240_v42  ;;  %v360_v14 = vadd.f32 %v850_v0, %v1099_v62  ;;  %v525_v43 = vadd.f32 %v524_v58, %v465_v20 }
  0x84   :  { %729 = vst [vmem:[#allocation7 + $0x60] sm:$0xff] %v770_v60  ;;  %v644_v33 = vmul.f32 %v643_v38, %v1286_v47  ;;  %v331_v17 = vadd.f32 %v1163_v8, %v271_v46  ;;  %v152_v34 = vmul.f32 %v1143_v30, %v121_v1  ;;  %v301_v22 = vmul.f32 0.5, %v300_v2 }
  0x85   :  { %v212_v39 = vmul.f32 %v1152_v51, %v181_v11  ;;  %v420_v26 = vadd.f32 %v1122_v56, %v1099_v62  ;;  %v585_v25 = vadd.f32 %v584_v53, %v525_v43  ;;  %v704_v28 = vmul.f32 %v703_v61, %v1296_v63 }
  0x86   :  { %v391_v12 = vadd.f32 %v1167_v59, %v331_v17  ;;  %v153_v29 = vadd.f32 %v152_v34, %v93_v40  ;;  %v272_v52 = vmul.f32 %v1156_v10, %v241_v13  ;;  %v361_v50 = vmul.f32 0.5, %v360_v14 }
  0x87   :  { %v645_v23 = vadd.f32 %v644_v33, %v585_v25  ;;  %v332_v30 = vmul.f32 %v1163_v8, %v301_v22  ;;  %v421_v51 = vmul.f32 0.5, %v420_v26  ;;  %v480_v44 = vadd.f32 %v1169_v3, %v1122_v56 }
  0x88   :  { %v451_v49 = vadd.f32 %v1197_v21, %v391_v12  ;;  %v213_v37 = vadd.f32 %v212_v39, %v153_v29  ;;  %v392_v45 = vmul.f32 %v1167_v59, %v361_v50  ;;  %v540_v8 = vadd.f32 %v1182_v35, %v1169_v3 }
  0x89   :  { %v705_v62 = vadd.f32 %v704_v28, %v645_v23  ;;  %v452_v41 = vmul.f32 %v1197_v21, %v421_v51  ;;  %v481_v24 = vmul.f32 0.5, %v480_v44  ;;  %v600_v58 = vadd.f32 %v1184_v16, %v1182_v35 }
  0x8a   :  { %v511_v55 = vadd.f32 %v1232_v15, %v451_v49  ;;  %v273_v32 = vadd.f32 %v272_v52, %v213_v37  ;;  %v541_v31 = vmul.f32 0.5, %v540_v8  ;;  %v660_v21 = vadd.f32 %v1188_v19, %v1184_v16 }
  0x8b   :  { %v730_v18 = vmul.f32 2.0, %v705_v62  ;;  %v512_v59 = vmul.f32 %v1232_v15, %v481_v24  ;;  %v601_v60 = vmul.f32 0.5, %v600_v58 }
  0x8c   :  { %v571_v10 = vadd.f32 %v1275_v54, %v511_v55  ;;  %v333_v27 = vadd.f32 %v332_v30, %v273_v32  ;;  %v572_v36 = vmul.f32 %v1275_v54, %v541_v31  ;;  %v661_v5 = vmul.f32 0.5, %v660_v21 }
  0x8d   :  { %v771_v4 = vadd.f32 -1.0, %v730_v18  ;;  %v632_v57 = vmul.f32 %v1286_v47, %v601_v60 }
  0x8e   :  { %v631_v48 = vadd.f32 %v1286_v47, %v571_v10  ;;  %v393_v56 = vadd.f32 %v392_v45, %v333_v27  ;;  %v692_v9 = vmul.f32 %v1296_v63, %v661_v5 }
  0x8f   :  { %733 = vst [vmem:[#allocation7 + $0x68] sm:$0xff] %v771_v4 }
  0x90   :  { %v691_v38 = vadd.f32 %v1296_v63, %v631_v48  ;;  %v453_v61 = vadd.f32 %v452_v41, %v393_v56 }
  0x92   :  { %v706_v53 = vadd.f32 0.001, %v691_v38  ;;  %737 = vst [vmem:[#allocation7 + $0x78] sm:$0xff] %v691_v38  ;;  %v513_v3 = vadd.f32 %v512_v59, %v453_v61 }
  0x94   :  { %843 = vrcp.f32 %v706_v53  ;;  %v573_v6 = vadd.f32 %v572_v36, %v513_v3  ;;  %vm712_vm6 = vweird.f32 %v706_v53  ;;  %v718_v35 = vand.u32 2147483648, %v706_v53 }
  0x95   :  { %v716_v40 = vand.u32 2147483647, %v706_v53 }
  0x96   :  { %v633_v42 = vadd.f32 %v632_v57, %v573_v6  ;;  %v719_v19 = vor.u32 1.1754944e-38, %v718_v35 }
  0x97   :  { %vm717_vm9 = vcmp.eq.f32.partialorder %v716_v40, 8.507059e+37 }
  0x98   :  { %v693_v46 = vadd.f32 %v692_v9, %v633_v42 }
  0x9a   :  { %v844_v7 = vpop.eup %843 }
  0x9b   :  { %v708_v15 = vmul.f32 %v844_v7, %v706_v53  ;;  %vm713_vm7 = vweird.f32 %v844_v7 }
  0x9c   :  { %vm714_vm8 = vmor %vm712_vm6, %vm713_vm7 }
  0x9d   :  { %v709_v20 = vsub.f32 1.0, %v708_v15 }
  0x9f   :  { %v710_v16 = vmul.f32 %v844_v7, %v709_v20 }
  0xa1   :  { %v711_v54 = vadd.f32 %v844_v7, %v710_v16 }
  0xa3   :  { %v715_v47 = vsel %vm714_vm8, %v844_v7, %v711_v54 }
  0xa4   :  { %v720_v63 = vsel %vm717_vm9, %v719_v19, %v715_v47 }
  0xa5   :  { %v721_v0 = vmul.f32 %v720_v63, %v693_v46 }
  0xa7   :  { %735 = vst [vmem:[#allocation7 + $0x70] sm:$0xff] %v721_v0 }
  0xa8   :  { %750 = dma.vmem_to_hbm [thread:$0]  %s743_s1, 2048, %s745_s23, [#allocation4], %s930_s17, %s930_s17, %s931_s18  }
  0xa9   :  { %927 = dma.done.wait [#allocation4], 2048  }
  0xaa   :  { %928 = vsyncadd [#allocation4], 4294965248 }
  0xab   :  { %755 = vsyncpa [#allocation3], 1 }
  0xac   :  { %756 = vsyncpa [#allocation6], 1 }
  0xad   :  { %757 = vsyncpa [#allocation4], 1 }

</bundles_post_ra>
